<compile_context>
chip_gen: v7x
topology: tpu7x:2x2x1
jax: 0.10.0
libtpu: 0.0.40
codegen_flags: <defaults>
</compile_context>

<pallas_src>
import functools

import jax
import jax.numpy as jnp
import numpy as np
from jax import lax
from jax.experimental import pallas as pl
from jax.experimental.pallas import tpu as pltpu

NEG_SLOPE = 0.01  # torch.nn.LeakyReLU() default negative_slope
BN_EPS = 1e-5

# Tap order k = (dy+1)*3 + (dx+1) == ky*3 + kx (matches fold_bn_params packing).
_OFFSETS = tuple((dy, dx) for dy in (-1, 0, 1) for dx in (-1, 0, 1))


def _leaky_relu(x):
    return jnp.where(x > 0, x, NEG_SLOPE * x)


def dark_residual_kernel(x_ref, w1_ref, b1_ref, w2_ref, b2_ref, o_ref, *, H, W, nb):
    # x_ref : (nb, C, H*W) f32   channels on sublanes, pixels on lanes (lane-dense)
    # w1_ref: (Cr, C)      bf16  1x1 conv weight (BN folded), resident
    # b1_ref: (Cr, 1)      f32   folded BN bias for conv1
    # w2_ref: (9, C, Cr)   bf16  3x3 conv weight [k, c_out, c_in] (BN folded), resident
    # b2_ref: (C, 1)       f32   folded BN bias for conv2
    # o_ref : (nb, C, H*W) f32
    HW = H * W

    # ---- hoisted boundary masks (built once; reused for every tap / image) ----
    pix = lax.broadcasted_iota(jnp.int32, (1, HW), 1)   # flat pixel index in image
    col = pix % W                                       # column index
    mask_l = col >= 1          # dx = -1 neighbor exists
    mask_r = col <= W - 2      # dx = +1 neighbor exists
    mask_t = pix >= W          # dy = -1 neighbor exists (not top row)
    mask_b = pix < HW - W      # dy = +1 neighbor exists (not bottom row)

    tap_masks = []
    for dy, dx in _OFFSETS:
        m = None
        if dy == -1:
            m = mask_t
        elif dy == 1:
            m = mask_b
        if dx == -1:
            m = mask_l if m is None else (m & mask_l)
        elif dx == 1:
            m = mask_r if m is None else (m & mask_r)
        tap_masks.append(m)   # None for the (0, 0) center tap

    w1 = w1_ref[...]           # (Cr, C)  bf16, resident across grid steps
    b1 = b1_ref[...]           # (Cr, 1)  f32
    b2 = b2_ref[...]           # (C, 1)   f32

    # Static unroll over the nb images in this block (amortizes per-step overhead).
    for b in range(nb):
        # ---- conv1: 1x1 conv == channel matmul (bf16 in, f32 acc) + BN + LeakyReLU ----
        y1 = jnp.dot(w1, x_ref[b].astype(jnp.bfloat16),
                     preferred_element_type=jnp.float32)          # (Cr, HW) f32
        y1 = _leaky_relu(y1 + b1)

        # ---- conv2: 3x3, stride 1, pad 1 -> 9 accumulating K=Cr matmuls ----
        # Tap (dy, dx): tap[:, i] = y1[:, i + dy*W + dx]; circular wrap from the
        # roll is zeroed by the precomputed boundary mask (applied in f32).
        acc = None
        for k, (dy, dx) in enumerate(_OFFSETS):
            delta = dy * W + dx
            tap = y1 if delta == 0 else pltpu.roll(y1, shift=(-delta) % HW, axis=1)
            m = tap_masks[k]
            if m is not None:
                tap = jnp.where(m, tap, jnp.zeros_like(tap))      # f32 select
            contrib = jnp.dot(w2_ref[k], tap.astype(jnp.bfloat16),
                              preferred_element_type=jnp.float32)  # (C, HW) f32
            acc = contrib if acc is None else acc + contrib
        y2 = _leaky_relu(acc + b2)

        # ---- residual add: re-read x_ref (no long-lived f32 x copy) ----
        o_ref[b] = (y2 + x_ref[b]).astype(o_ref.dtype)


@functools.partial(jax.jit, static_argnames=("nb",))
def dark_residual_block(x_nchw, w1, b1, w2, b2, *, nb=2):
    """x_nchw: (N, C, H, W) f32.  Params are BN-folded:
    w1 (Cr, C) bf16, b1 (Cr, 1) f32, w2 (9, C, Cr) bf16, b2 (C, 1) f32."""
    N, C, H, W = x_nchw.shape
    Cr = w1.shape[0]
    assert N % nb == 0, "batch must be divisible by the per-step batch block"
    x2 = x_nchw.reshape(N, C, H * W)        # free reshape, no transpose

    out = pl.pallas_call(
        functools.partial(dark_residual_kernel, H=H, W=W, nb=nb),
        out_shape=jax.ShapeDtypeStruct((N, C, H * W), x_nchw.dtype),
        grid_spec=pltpu.PrefetchScalarGridSpec(
            num_scalar_prefetch=0,
            grid=(N // nb,),   # >= 2 parallel steps keeps both v7x TCs busy
            in_specs=[
                pl.BlockSpec((nb, C, H * W), lambda n: (n, 0, 0)),   # x block
                pl.BlockSpec((Cr, C), lambda n: (0, 0)),             # w1 (resident)
                pl.BlockSpec((Cr, 1), lambda n: (0, 0)),             # b1
                pl.BlockSpec((9, C, Cr), lambda n: (0, 0, 0)),       # w2 (resident)
                pl.BlockSpec((C, 1), lambda n: (0, 0)),              # b2
            ],
            out_specs=pl.BlockSpec((nb, C, H * W), lambda n: (n, 0, 0)),
        ),
        compiler_params=pltpu.CompilerParams(
            dimension_semantics=("parallel",)),
    )(x2, w1, b1, w2, b2)

    return out.reshape(N, C, H, W)


def fold_bn_params(w1_torch, w2_torch, g1, be1, mu1, v1, g2, be2, mu2, v2):
    """Fold eval-mode BatchNorm into conv weights/biases and pack for the kernel."""
    Cr, C = w1_torch.shape[0], w1_torch.shape[1]
    s1 = g1 / jnp.sqrt(v1 + BN_EPS)
    w1mat = w1_torch[:, :, 0, 0] * s1[:, None]                        # (Cr, C)
    b1 = (be1 - mu1 * s1)[:, None]                                    # (Cr, 1)
    s2 = g2 / jnp.sqrt(v2 + BN_EPS)
    # (C, Cr, 3, 3) -> (3, 3, C, Cr) -> (9, C, Cr): [k = ky*3+kx, c_out, c_in]
    w2pk = jnp.transpose(w2_torch, (2, 3, 0, 1)).reshape(9, C, Cr) * s2[None, :, None]
    b2 = (be2 - mu2 * s2)[:, None]                                    # (C, 1)
    return (w1mat.astype(jnp.bfloat16), b1.astype(jnp.float32),
            w2pk.astype(jnp.bfloat16), b2.astype(jnp.float32))


def reference(x_nchw, w1, b1, w2, b2):
    """Pure-JAX reference with matching folded-BN + bf16-matmul numerics."""
    N, C, H, W = x_nchw.shape
    Cr = w1.shape[0]
    w1c = w1.astype(jnp.bfloat16).reshape(Cr, C, 1, 1)                        # OIHW
    y1 = lax.conv_general_dilated(
        x_nchw.astype(jnp.bfloat16), w1c, (1, 1), 'VALID',
        dimension_numbers=('NCHW', 'OIHW', 'NCHW'),
        preferred_element_type=jnp.float32) + b1.reshape(1, Cr, 1, 1)
    y1 = _leaky_relu(y1)
    w2c = w2.reshape(3, 3, C, Cr).transpose(2, 3, 0, 1).astype(jnp.bfloat16)  # OIHW
    y2 = lax.conv_general_dilated(
        y1.astype(jnp.bfloat16), w2c, (1, 1), ((1, 1), (1, 1)),
        dimension_numbers=('NCHW', 'OIHW', 'NCHW'),
        preferred_element_type=jnp.float32) + b2.reshape(1, C, 1, 1)
    y2 = _leaky_relu(y2)
    return y2 + x_nchw


if __name__ == "__main__":
    key = jax.random.PRNGKey(0)
    N, C, H, W = 4, 8, 16, 16           # input_layer = C = 8 (H*W = 256 lanes)
    Cr = C // 2                         # reduced_channels = 4
    nb = 2                              # images per grid step (grid has 2 parallel steps)

    ks = jax.random.split(key, 11)
    x = jax.random.normal(ks[0], (N, C, H, W), jnp.float32)

    # Conv weights in PyTorch layout.
    w1_torch = 0.1 * jax.random.normal(ks[1], (Cr, C, 1, 1), jnp.float32)   # (Cout,Cin,1,1)
    w2_torch = 0.1 * jax.random.normal(ks[2], (C, Cr, 3, 3), jnp.float32)   # (Cout,Cin,3,3)

    # Synthetic BatchNorm params / running stats (eval-mode semantics).
    g1 = 1.0 + 0.1 * jax.random.normal(ks[3], (Cr,), jnp.float32)
    be1 = 0.1 * jax.random.normal(ks[4], (Cr,), jnp.float32)
    mu1 = 0.1 * jax.random.normal(ks[5], (Cr,), jnp.float32)
    v1 = jnp.abs(1.0 + 0.1 * jax.random.normal(ks[6], (Cr,), jnp.float32))
    g2 = 1.0 + 0.1 * jax.random.normal(ks[7], (C,), jnp.float32)
    be2 = 0.1 * jax.random.normal(ks[8], (C,), jnp.float32)
    mu2 = 0.1 * jax.random.normal(ks[9], (C,), jnp.float32)
    v2 = jnp.abs(1.0 + 0.1 * jax.random.normal(ks[10], (C,), jnp.float32))

    w1f, b1f, w2f, b2f = fold_bn_params(w1_torch, w2_torch,
                                        g1, be1, mu1, v1, g2, be2, mu2, v2)

    out = dark_residual_block(x, w1f, b1f, w2f, b2f, nb=nb)
    out = jax.block_until_ready(out)

    ref = reference(x, w1f, b1f, w2f, b2f)
    np.testing.assert_allclose(np.asarray(out), np.asarray(ref),
                               rtol=1e-2, atol=1e-2)
    assert out.shape == (N, C, H, W) and out.dtype == jnp.float32

    print("KERNEL_OK")
</pallas_src>

<mosaic_0001>
module attributes {stable_mosaic.version = 11 : i64} {
  func.func @dark_residual_kernel(%arg0: i32, %arg1: memref<2x8x256xf32, #tpu.memory_space<vmem>>, %arg2: memref<4x8xbf16, #tpu.memory_space<vmem>>, %arg3: memref<4x1xf32, #tpu.memory_space<vmem>>, %arg4: memref<9x8x4xbf16, #tpu.memory_space<vmem>>, %arg5: memref<8x1xf32, #tpu.memory_space<vmem>>, %arg6: memref<2x8x256xf32, #tpu.memory_space<vmem>>) attributes {dimension_semantics = [#tpu.dimension_semantics<parallel>], iteration_bounds = array<i64: 2>, scalar_prefetch = 0 : i64, scratch_operands = 0 : i64, tpu.core_type = #tpu.core_type<tc>, window_params = [{transform_indices = @transform_0, window_bounds = array<i64: 2, 8, 256>}, {pipeline_mode = #tpu.pipeline_mode<synchronous>, transform_indices = @transform_1, window_bounds = array<i64: 4, 8>}, {pipeline_mode = #tpu.pipeline_mode<synchronous>, transform_indices = @transform_2, window_bounds = array<i64: 4, 1>}, {pipeline_mode = #tpu.pipeline_mode<synchronous>, transform_indices = @transform_3, window_bounds = array<i64: 9, 8, 4>}, {pipeline_mode = #tpu.pipeline_mode<synchronous>, transform_indices = @transform_4, window_bounds = array<i64: 8, 1>}, {transform_indices = @transform_5, window_bounds = array<i64: 2, 8, 256>}]} {
    %0 = tpu.iota {dimensions = array<i32: 1>} : vector<1x256xi32>
    %c16_i32 = arith.constant 16 : i32
    %c0_i32 = arith.constant 0 : i32
    %1 = arith.cmpi eq, %c16_i32, %c0_i32 : i32
    %c1_i32 = arith.constant 1 : i32
    %2 = arith.select %1, %c1_i32, %c16_i32 : i32
    %3 = vector.broadcast %2 : i32 to vector<1x256xi32>
    %4 = arith.remsi %0, %3 : vector<1x256xi32>
    %c0_i32_0 = arith.constant 0 : i32
    %5 = vector.broadcast %c0_i32_0 : i32 to vector<1x256xi32>
    %6 = arith.cmpi ne, %4, %5 : vector<1x256xi32>
    %c0_i32_1 = arith.constant 0 : i32
    %7 = vector.broadcast %c0_i32_1 : i32 to vector<1x256xi32>
    %8 = arith.cmpi slt, %4, %7 : vector<1x256xi32>
    %c0_i32_2 = arith.constant 0 : i32
    %9 = arith.cmpi slt, %2, %c0_i32_2 : i32
    %10 = vector.broadcast %9 : i1 to vector<1x256xi1>
    %11 = vector.broadcast %10 : vector<1x256xi1> to vector<1x256xi1>
    %12 = arith.xori %8, %11 : vector<1x256xi1>
    %13 = arith.andi %12, %6 : vector<1x256xi1>
    %14 = vector.broadcast %2 : i32 to vector<1x256xi32>
    %15 = arith.addi %4, %14 : vector<1x256xi32>
    %16 = arith.select %13, %15, %4 : vector<1x256xi1>, vector<1x256xi32>
    %c1_i32_3 = arith.constant 1 : i32
    %17 = vector.broadcast %c1_i32_3 : i32 to vector<1x256xi32>
    %18 = arith.cmpi sge, %16, %17 : vector<1x256xi32>
    %c14_i32 = arith.constant 14 : i32
    %19 = vector.broadcast %c14_i32 : i32 to vector<1x256xi32>
    %20 = arith.cmpi sle, %16, %19 : vector<1x256xi32>
    %c16_i32_4 = arith.constant 16 : i32
    %21 = vector.broadcast %c16_i32_4 : i32 to vector<1x256xi32>
    %22 = arith.cmpi sge, %0, %21 : vector<1x256xi32>
    %c240_i32 = arith.constant 240 : i32
    %23 = vector.broadcast %c240_i32 : i32 to vector<1x256xi32>
    %24 = arith.cmpi slt, %0, %23 : vector<1x256xi32>
    %25 = arith.andi %22, %18 : vector<1x256xi1>
    %26 = arith.andi %22, %20 : vector<1x256xi1>
    %27 = arith.andi %24, %18 : vector<1x256xi1>
    %28 = arith.andi %24, %20 : vector<1x256xi1>
    %c0 = arith.constant 0 : index
    %c0_5 = arith.constant 0 : index
    %29 = vector.load %arg2[%c0, %c0_5] : memref<4x8xbf16, #tpu.memory_space<vmem>>, vector<4x8xbf16>
    %c0_6 = arith.constant 0 : index
    %c0_7 = arith.constant 0 : index
    %30 = vector.load %arg3[%c0_6, %c0_7] : memref<4x1xf32, #tpu.memory_space<vmem>>, vector<4x1xf32>
    %c0_8 = arith.constant 0 : index
    %c0_9 = arith.constant 0 : index
    %31 = vector.load %arg5[%c0_8, %c0_9] : memref<8x1xf32, #tpu.memory_space<vmem>>, vector<8x1xf32>
    %c0_10 = arith.constant 0 : index
    %c0_11 = arith.constant 0 : index
    %c0_12 = arith.constant 0 : index
    %32 = vector.load %arg1[%c0_10, %c0_11, %c0_12] : memref<2x8x256xf32, #tpu.memory_space<vmem>>, vector<1x8x256xf32>
    %33 = vector.shape_cast %32 : vector<1x8x256xf32> to vector<8x256xf32>
    %34 = arith.truncf %33 : vector<8x256xf32> to vector<8x256xbf16>
    %cst = arith.constant dense<0.000000e+00> : vector<4x256xf32>
    %35 = tpu.matmul %29, %34, %cst {dimension_numbers = #tpu.dot_dimension_numbers<[1], [0], [0], [1], [0, 0, 1, 1], [], []>} : vector<4x8xbf16>, vector<8x256xbf16>, vector<4x256xf32> -> vector<4x256xf32>
    %36 = vector.broadcast %30 : vector<4x1xf32> to vector<4x256xf32>
    %37 = arith.addf %35, %36 : vector<4x256xf32>
    %cst_13 = arith.constant 0.000000e+00 : f32
    %38 = vector.broadcast %cst_13 : f32 to vector<4x256xf32>
    %39 = arith.cmpf ogt, %37, %38 : vector<4x256xf32>
    %cst_14 = arith.constant 0.00999999977 : f32
    %40 = vector.broadcast %cst_14 : f32 to vector<4x256xf32>
    %41 = arith.mulf %40, %37 : vector<4x256xf32>
    %42 = arith.select %39, %37, %41 : vector<4x256xi1>, vector<4x256xf32>
    %c17_i32 = arith.constant 17 : i32
    %43 = tpu.dynamic_rotate %42 by %c17_i32 dim 1 : vector<4x256xf32>, i32 -> vector<4x256xf32>
    %cst_15 = arith.constant 0.000000e+00 : f32
    %44 = vector.broadcast %cst_15 : f32 to vector<4x256xf32>
    %45 = vector.shape_cast %25 : vector<1x256xi1> to vector<1x256xi1>
    %46 = vector.broadcast %45 : vector<1x256xi1> to vector<4x256xi1>
    %47 = arith.select %46, %43, %44 : vector<4x256xi1>, vector<4x256xf32>
    %c0_16 = arith.constant 0 : index
    %c0_17 = arith.constant 0 : index
    %c0_18 = arith.constant 0 : index
    %48 = vector.load %arg4[%c0_16, %c0_17, %c0_18] : memref<9x8x4xbf16, #tpu.memory_space<vmem>>, vector<1x8x4xbf16>
    %49 = vector.shape_cast %48 : vector<1x8x4xbf16> to vector<8x4xbf16>
    %50 = arith.truncf %47 : vector<4x256xf32> to vector<4x256xbf16>
    %cst_19 = arith.constant dense<0.000000e+00> : vector<8x256xf32>
    %51 = tpu.matmul %49, %50, %cst_19 {dimension_numbers = #tpu.dot_dimension_numbers<[1], [0], [0], [1], [0, 0, 1, 1], [], []>} : vector<8x4xbf16>, vector<4x256xbf16>, vector<8x256xf32> -> vector<8x256xf32>
    %c16_i32_20 = arith.constant 16 : i32
    %52 = tpu.dynamic_rotate %42 by %c16_i32_20 dim 1 : vector<4x256xf32>, i32 -> vector<4x256xf32>
    %cst_21 = arith.constant 0.000000e+00 : f32
    %53 = vector.broadcast %cst_21 : f32 to vector<4x256xf32>
    %54 = vector.shape_cast %22 : vector<1x256xi1> to vector<1x256xi1>
    %55 = vector.broadcast %54 : vector<1x256xi1> to vector<4x256xi1>
    %56 = arith.select %55, %52, %53 : vector<4x256xi1>, vector<4x256xf32>
    %c1 = arith.constant 1 : index
    %c0_22 = arith.constant 0 : index
    %c0_23 = arith.constant 0 : index
    %57 = vector.load %arg4[%c1, %c0_22, %c0_23] : memref<9x8x4xbf16, #tpu.memory_space<vmem>>, vector<1x8x4xbf16>
    %58 = vector.shape_cast %57 : vector<1x8x4xbf16> to vector<8x4xbf16>
    %59 = arith.truncf %56 : vector<4x256xf32> to vector<4x256xbf16>
    %cst_24 = arith.constant dense<0.000000e+00> : vector<8x256xf32>
    %60 = tpu.matmul %58, %59, %cst_24 {dimension_numbers = #tpu.dot_dimension_numbers<[1], [0], [0], [1], [0, 0, 1, 1], [], []>} : vector<8x4xbf16>, vector<4x256xbf16>, vector<8x256xf32> -> vector<8x256xf32>
    %61 = arith.addf %51, %60 : vector<8x256xf32>
    %c15_i32 = arith.constant 15 : i32
    %62 = tpu.dynamic_rotate %42 by %c15_i32 dim 1 : vector<4x256xf32>, i32 -> vector<4x256xf32>
    %cst_25 = arith.constant 0.000000e+00 : f32
    %63 = vector.broadcast %cst_25 : f32 to vector<4x256xf32>
    %64 = vector.shape_cast %26 : vector<1x256xi1> to vector<1x256xi1>
    %65 = vector.broadcast %64 : vector<1x256xi1> to vector<4x256xi1>
    %66 = arith.select %65, %62, %63 : vector<4x256xi1>, vector<4x256xf32>
    %c2 = arith.constant 2 : index
    %c0_26 = arith.constant 0 : index
    %c0_27 = arith.constant 0 : index
    %67 = vector.load %arg4[%c2, %c0_26, %c0_27] : memref<9x8x4xbf16, #tpu.memory_space<vmem>>, vector<1x8x4xbf16>
    %68 = vector.shape_cast %67 : vector<1x8x4xbf16> to vector<8x4xbf16>
    %69 = arith.truncf %66 : vector<4x256xf32> to vector<4x256xbf16>
    %cst_28 = arith.constant dense<0.000000e+00> : vector<8x256xf32>
    %70 = tpu.matmul %68, %69, %cst_28 {dimension_numbers = #tpu.dot_dimension_numbers<[1], [0], [0], [1], [0, 0, 1, 1], [], []>} : vector<8x4xbf16>, vector<4x256xbf16>, vector<8x256xf32> -> vector<8x256xf32>
    %71 = arith.addf %61, %70 : vector<8x256xf32>
    %c1_i32_29 = arith.constant 1 : i32
    %72 = tpu.dynamic_rotate %42 by %c1_i32_29 dim 1 : vector<4x256xf32>, i32 -> vector<4x256xf32>
    %cst_30 = arith.constant 0.000000e+00 : f32
    %73 = vector.broadcast %cst_30 : f32 to vector<4x256xf32>
    %74 = vector.shape_cast %18 : vector<1x256xi1> to vector<1x256xi1>
    %75 = vector.broadcast %74 : vector<1x256xi1> to vector<4x256xi1>
    %76 = arith.select %75, %72, %73 : vector<4x256xi1>, vector<4x256xf32>
    %c3 = arith.constant 3 : index
    %c0_31 = arith.constant 0 : index
    %c0_32 = arith.constant 0 : index
    %77 = vector.load %arg4[%c3, %c0_31, %c0_32] : memref<9x8x4xbf16, #tpu.memory_space<vmem>>, vector<1x8x4xbf16>
    %78 = vector.shape_cast %77 : vector<1x8x4xbf16> to vector<8x4xbf16>
    %79 = arith.truncf %76 : vector<4x256xf32> to vector<4x256xbf16>
    %cst_33 = arith.constant dense<0.000000e+00> : vector<8x256xf32>
    %80 = tpu.matmul %78, %79, %cst_33 {dimension_numbers = #tpu.dot_dimension_numbers<[1], [0], [0], [1], [0, 0, 1, 1], [], []>} : vector<8x4xbf16>, vector<4x256xbf16>, vector<8x256xf32> -> vector<8x256xf32>
    %81 = arith.addf %71, %80 : vector<8x256xf32>
    %c4 = arith.constant 4 : index
    %c0_34 = arith.constant 0 : index
    %c0_35 = arith.constant 0 : index
    %82 = vector.load %arg4[%c4, %c0_34, %c0_35] : memref<9x8x4xbf16, #tpu.memory_space<vmem>>, vector<1x8x4xbf16>
    %83 = vector.shape_cast %82 : vector<1x8x4xbf16> to vector<8x4xbf16>
    %84 = arith.truncf %42 : vector<4x256xf32> to vector<4x256xbf16>
    %cst_36 = arith.constant dense<0.000000e+00> : vector<8x256xf32>
    %85 = tpu.matmul %83, %84, %cst_36 {dimension_numbers = #tpu.dot_dimension_numbers<[1], [0], [0], [1], [0, 0, 1, 1], [], []>} : vector<8x4xbf16>, vector<4x256xbf16>, vector<8x256xf32> -> vector<8x256xf32>
    %86 = arith.addf %81, %85 : vector<8x256xf32>
    %c255_i32 = arith.constant 255 : i32
    %87 = tpu.dynamic_rotate %42 by %c255_i32 dim 1 : vector<4x256xf32>, i32 -> vector<4x256xf32>
    %cst_37 = arith.constant 0.000000e+00 : f32
    %88 = vector.broadcast %cst_37 : f32 to vector<4x256xf32>
    %89 = vector.shape_cast %20 : vector<1x256xi1> to vector<1x256xi1>
    %90 = vector.broadcast %89 : vector<1x256xi1> to vector<4x256xi1>
    %91 = arith.select %90, %87, %88 : vector<4x256xi1>, vector<4x256xf32>
    %c5 = arith.constant 5 : index
    %c0_38 = arith.constant 0 : index
    %c0_39 = arith.constant 0 : index
    %92 = vector.load %arg4[%c5, %c0_38, %c0_39] : memref<9x8x4xbf16, #tpu.memory_space<vmem>>, vector<1x8x4xbf16>
    %93 = vector.shape_cast %92 : vector<1x8x4xbf16> to vector<8x4xbf16>
    %94 = arith.truncf %91 : vector<4x256xf32> to vector<4x256xbf16>
    %cst_40 = arith.constant dense<0.000000e+00> : vector<8x256xf32>
    %95 = tpu.matmul %93, %94, %cst_40 {dimension_numbers = #tpu.dot_dimension_numbers<[1], [0], [0], [1], [0, 0, 1, 1], [], []>} : vector<8x4xbf16>, vector<4x256xbf16>, vector<8x256xf32> -> vector<8x256xf32>
    %96 = arith.addf %86, %95 : vector<8x256xf32>
    %c241_i32 = arith.constant 241 : i32
    %97 = tpu.dynamic_rotate %42 by %c241_i32 dim 1 : vector<4x256xf32>, i32 -> vector<4x256xf32>
    %cst_41 = arith.constant 0.000000e+00 : f32
    %98 = vector.broadcast %cst_41 : f32 to vector<4x256xf32>
    %99 = vector.shape_cast %27 : vector<1x256xi1> to vector<1x256xi1>
    %100 = vector.broadcast %99 : vector<1x256xi1> to vector<4x256xi1>
    %101 = arith.select %100, %97, %98 : vector<4x256xi1>, vector<4x256xf32>
    %c6 = arith.constant 6 : index
    %c0_42 = arith.constant 0 : index
    %c0_43 = arith.constant 0 : index
    %102 = vector.load %arg4[%c6, %c0_42, %c0_43] : memref<9x8x4xbf16, #tpu.memory_space<vmem>>, vector<1x8x4xbf16>
    %103 = vector.shape_cast %102 : vector<1x8x4xbf16> to vector<8x4xbf16>
    %104 = arith.truncf %101 : vector<4x256xf32> to vector<4x256xbf16>
    %cst_44 = arith.constant dense<0.000000e+00> : vector<8x256xf32>
    %105 = tpu.matmul %103, %104, %cst_44 {dimension_numbers = #tpu.dot_dimension_numbers<[1], [0], [0], [1], [0, 0, 1, 1], [], []>} : vector<8x4xbf16>, vector<4x256xbf16>, vector<8x256xf32> -> vector<8x256xf32>
    %106 = arith.addf %96, %105 : vector<8x256xf32>
    %c240_i32_45 = arith.constant 240 : i32
    %107 = tpu.dynamic_rotate %42 by %c240_i32_45 dim 1 : vector<4x256xf32>, i32 -> vector<4x256xf32>
    %cst_46 = arith.constant 0.000000e+00 : f32
    %108 = vector.broadcast %cst_46 : f32 to vector<4x256xf32>
    %109 = vector.shape_cast %24 : vector<1x256xi1> to vector<1x256xi1>
    %110 = vector.broadcast %109 : vector<1x256xi1> to vector<4x256xi1>
    %111 = arith.select %110, %107, %108 : vector<4x256xi1>, vector<4x256xf32>
    %c7 = arith.constant 7 : index
    %c0_47 = arith.constant 0 : index
    %c0_48 = arith.constant 0 : index
    %112 = vector.load %arg4[%c7, %c0_47, %c0_48] : memref<9x8x4xbf16, #tpu.memory_space<vmem>>, vector<1x8x4xbf16>
    %113 = vector.shape_cast %112 : vector<1x8x4xbf16> to vector<8x4xbf16>
    %114 = arith.truncf %111 : vector<4x256xf32> to vector<4x256xbf16>
    %cst_49 = arith.constant dense<0.000000e+00> : vector<8x256xf32>
    %115 = tpu.matmul %113, %114, %cst_49 {dimension_numbers = #tpu.dot_dimension_numbers<[1], [0], [0], [1], [0, 0, 1, 1], [], []>} : vector<8x4xbf16>, vector<4x256xbf16>, vector<8x256xf32> -> vector<8x256xf32>
    %116 = arith.addf %106, %115 : vector<8x256xf32>
    %c239_i32 = arith.constant 239 : i32
    %117 = tpu.dynamic_rotate %42 by %c239_i32 dim 1 : vector<4x256xf32>, i32 -> vector<4x256xf32>
    %cst_50 = arith.constant 0.000000e+00 : f32
    %118 = vector.broadcast %cst_50 : f32 to vector<4x256xf32>
    %119 = vector.shape_cast %28 : vector<1x256xi1> to vector<1x256xi1>
    %120 = vector.broadcast %119 : vector<1x256xi1> to vector<4x256xi1>
    %121 = arith.select %120, %117, %118 : vector<4x256xi1>, vector<4x256xf32>
    %c8 = arith.constant 8 : index
    %c0_51 = arith.constant 0 : index
    %c0_52 = arith.constant 0 : index
    %122 = vector.load %arg4[%c8, %c0_51, %c0_52] : memref<9x8x4xbf16, #tpu.memory_space<vmem>>, vector<1x8x4xbf16>
    %123 = vector.shape_cast %122 : vector<1x8x4xbf16> to vector<8x4xbf16>
    %124 = arith.truncf %121 : vector<4x256xf32> to vector<4x256xbf16>
    %cst_53 = arith.constant dense<0.000000e+00> : vector<8x256xf32>
    %125 = tpu.matmul %123, %124, %cst_53 {dimension_numbers = #tpu.dot_dimension_numbers<[1], [0], [0], [1], [0, 0, 1, 1], [], []>} : vector<8x4xbf16>, vector<4x256xbf16>, vector<8x256xf32> -> vector<8x256xf32>
    %126 = arith.addf %116, %125 : vector<8x256xf32>
    %127 = vector.broadcast %31 : vector<8x1xf32> to vector<8x256xf32>
    %128 = arith.addf %126, %127 : vector<8x256xf32>
    %cst_54 = arith.constant 0.000000e+00 : f32
    %129 = vector.broadcast %cst_54 : f32 to vector<8x256xf32>
    %130 = arith.cmpf ogt, %128, %129 : vector<8x256xf32>
    %cst_55 = arith.constant 0.00999999977 : f32
    %131 = vector.broadcast %cst_55 : f32 to vector<8x256xf32>
    %132 = arith.mulf %131, %128 : vector<8x256xf32>
    %133 = arith.select %130, %128, %132 : vector<8x256xi1>, vector<8x256xf32>
    %c0_56 = arith.constant 0 : index
    %c0_57 = arith.constant 0 : index
    %c0_58 = arith.constant 0 : index
    %134 = vector.load %arg1[%c0_56, %c0_57, %c0_58] : memref<2x8x256xf32, #tpu.memory_space<vmem>>, vector<1x8x256xf32>
    %135 = vector.shape_cast %134 : vector<1x8x256xf32> to vector<8x256xf32>
    %136 = arith.addf %133, %135 : vector<8x256xf32>
    %c0_59 = arith.constant 0 : index
    %c0_60 = arith.constant 0 : index
    %c0_61 = arith.constant 0 : index
    %137 = vector.load %arg6[%c0_59, %c0_60, %c0_61] : memref<2x8x256xf32, #tpu.memory_space<vmem>>, vector<1x8x256xf32>
    %138 = vector.shape_cast %137 : vector<1x8x256xf32> to vector<8x256xf32>
    %139 = vector.shape_cast %136 : vector<8x256xf32> to vector<1x8x256xf32>
    tpu.vector_store %arg6[%c0_59, %c0_60, %c0_61], %139 {strides = array<i32>} : memref<2x8x256xf32, #tpu.memory_space<vmem>>, vector<1x8x256xf32>,
    %c1_62 = arith.constant 1 : index
    %c0_63 = arith.constant 0 : index
    %c0_64 = arith.constant 0 : index
    %140 = vector.load %arg1[%c1_62, %c0_63, %c0_64] : memref<2x8x256xf32, #tpu.memory_space<vmem>>, vector<1x8x256xf32>
    %141 = vector.shape_cast %140 : vector<1x8x256xf32> to vector<8x256xf32>
    %142 = arith.truncf %141 : vector<8x256xf32> to vector<8x256xbf16>
    %cst_65 = arith.constant dense<0.000000e+00> : vector<4x256xf32>
    %143 = tpu.matmul %29, %142, %cst_65 {dimension_numbers = #tpu.dot_dimension_numbers<[1], [0], [0], [1], [0, 0, 1, 1], [], []>} : vector<4x8xbf16>, vector<8x256xbf16>, vector<4x256xf32> -> vector<4x256xf32>
    %144 = vector.broadcast %30 : vector<4x1xf32> to vector<4x256xf32>
    %145 = arith.addf %143, %144 : vector<4x256xf32>
    %cst_66 = arith.constant 0.000000e+00 : f32
    %146 = vector.broadcast %cst_66 : f32 to vector<4x256xf32>
    %147 = arith.cmpf ogt, %145, %146 : vector<4x256xf32>
    %cst_67 = arith.constant 0.00999999977 : f32
    %148 = vector.broadcast %cst_67 : f32 to vector<4x256xf32>
    %149 = arith.mulf %148, %145 : vector<4x256xf32>
    %150 = arith.select %147, %145, %149 : vector<4x256xi1>, vector<4x256xf32>
    %c17_i32_68 = arith.constant 17 : i32
    %151 = tpu.dynamic_rotate %150 by %c17_i32_68 dim 1 : vector<4x256xf32>, i32 -> vector<4x256xf32>
    %cst_69 = arith.constant 0.000000e+00 : f32
    %152 = vector.broadcast %cst_69 : f32 to vector<4x256xf32>
    %153 = vector.shape_cast %25 : vector<1x256xi1> to vector<1x256xi1>
    %154 = vector.broadcast %153 : vector<1x256xi1> to vector<4x256xi1>
    %155 = arith.select %154, %151, %152 : vector<4x256xi1>, vector<4x256xf32>
    %c0_70 = arith.constant 0 : index
    %c0_71 = arith.constant 0 : index
    %c0_72 = arith.constant 0 : index
    %156 = vector.load %arg4[%c0_70, %c0_71, %c0_72] : memref<9x8x4xbf16, #tpu.memory_space<vmem>>, vector<1x8x4xbf16>
    %157 = vector.shape_cast %156 : vector<1x8x4xbf16> to vector<8x4xbf16>
    %158 = arith.truncf %155 : vector<4x256xf32> to vector<4x256xbf16>
    %cst_73 = arith.constant dense<0.000000e+00> : vector<8x256xf32>
    %159 = tpu.matmul %157, %158, %cst_73 {dimension_numbers = #tpu.dot_dimension_numbers<[1], [0], [0], [1], [0, 0, 1, 1], [], []>} : vector<8x4xbf16>, vector<4x256xbf16>, vector<8x256xf32> -> vector<8x256xf32>
    %c16_i32_74 = arith.constant 16 : i32
    %160 = tpu.dynamic_rotate %150 by %c16_i32_74 dim 1 : vector<4x256xf32>, i32 -> vector<4x256xf32>
    %cst_75 = arith.constant 0.000000e+00 : f32
    %161 = vector.broadcast %cst_75 : f32 to vector<4x256xf32>
    %162 = vector.shape_cast %22 : vector<1x256xi1> to vector<1x256xi1>
    %163 = vector.broadcast %162 : vector<1x256xi1> to vector<4x256xi1>
    %164 = arith.select %163, %160, %161 : vector<4x256xi1>, vector<4x256xf32>
    %c1_76 = arith.constant 1 : index
    %c0_77 = arith.constant 0 : index
    %c0_78 = arith.constant 0 : index
    %165 = vector.load %arg4[%c1_76, %c0_77, %c0_78] : memref<9x8x4xbf16, #tpu.memory_space<vmem>>, vector<1x8x4xbf16>
    %166 = vector.shape_cast %165 : vector<1x8x4xbf16> to vector<8x4xbf16>
    %167 = arith.truncf %164 : vector<4x256xf32> to vector<4x256xbf16>
    %cst_79 = arith.constant dense<0.000000e+00> : vector<8x256xf32>
    %168 = tpu.matmul %166, %167, %cst_79 {dimension_numbers = #tpu.dot_dimension_numbers<[1], [0], [0], [1], [0, 0, 1, 1], [], []>} : vector<8x4xbf16>, vector<4x256xbf16>, vector<8x256xf32> -> vector<8x256xf32>
    %169 = arith.addf %159, %168 : vector<8x256xf32>
    %c15_i32_80 = arith.constant 15 : i32
    %170 = tpu.dynamic_rotate %150 by %c15_i32_80 dim 1 : vector<4x256xf32>, i32 -> vector<4x256xf32>
    %cst_81 = arith.constant 0.000000e+00 : f32
    %171 = vector.broadcast %cst_81 : f32 to vector<4x256xf32>
    %172 = vector.shape_cast %26 : vector<1x256xi1> to vector<1x256xi1>
    %173 = vector.broadcast %172 : vector<1x256xi1> to vector<4x256xi1>
    %174 = arith.select %173, %170, %171 : vector<4x256xi1>, vector<4x256xf32>
    %c2_82 = arith.constant 2 : index
    %c0_83 = arith.constant 0 : index
    %c0_84 = arith.constant 0 : index
    %175 = vector.load %arg4[%c2_82, %c0_83, %c0_84] : memref<9x8x4xbf16, #tpu.memory_space<vmem>>, vector<1x8x4xbf16>
    %176 = vector.shape_cast %175 : vector<1x8x4xbf16> to vector<8x4xbf16>
    %177 = arith.truncf %174 : vector<4x256xf32> to vector<4x256xbf16>
    %cst_85 = arith.constant dense<0.000000e+00> : vector<8x256xf32>
    %178 = tpu.matmul %176, %177, %cst_85 {dimension_numbers = #tpu.dot_dimension_numbers<[1], [0], [0], [1], [0, 0, 1, 1], [], []>} : vector<8x4xbf16>, vector<4x256xbf16>, vector<8x256xf32> -> vector<8x256xf32>
    %179 = arith.addf %169, %178 : vector<8x256xf32>
    %c1_i32_86 = arith.constant 1 : i32
    %180 = tpu.dynamic_rotate %150 by %c1_i32_86 dim 1 : vector<4x256xf32>, i32 -> vector<4x256xf32>
    %cst_87 = arith.constant 0.000000e+00 : f32
    %181 = vector.broadcast %cst_87 : f32 to vector<4x256xf32>
    %182 = vector.shape_cast %18 : vector<1x256xi1> to vector<1x256xi1>
    %183 = vector.broadcast %182 : vector<1x256xi1> to vector<4x256xi1>
    %184 = arith.select %183, %180, %181 : vector<4x256xi1>, vector<4x256xf32>
    %c3_88 = arith.constant 3 : index
    %c0_89 = arith.constant 0 : index
    %c0_90 = arith.constant 0 : index
    %185 = vector.load %arg4[%c3_88, %c0_89, %c0_90] : memref<9x8x4xbf16, #tpu.memory_space<vmem>>, vector<1x8x4xbf16>
    %186 = vector.shape_cast %185 : vector<1x8x4xbf16> to vector<8x4xbf16>
    %187 = arith.truncf %184 : vector<4x256xf32> to vector<4x256xbf16>
    %cst_91 = arith.constant dense<0.000000e+00> : vector<8x256xf32>
    %188 = tpu.matmul %186, %187, %cst_91 {dimension_numbers = #tpu.dot_dimension_numbers<[1], [0], [0], [1], [0, 0, 1, 1], [], []>} : vector<8x4xbf16>, vector<4x256xbf16>, vector<8x256xf32> -> vector<8x256xf32>
    %189 = arith.addf %179, %188 : vector<8x256xf32>
    %c4_92 = arith.constant 4 : index
    %c0_93 = arith.constant 0 : index
    %c0_94 = arith.constant 0 : index
    %190 = vector.load %arg4[%c4_92, %c0_93, %c0_94] : memref<9x8x4xbf16, #tpu.memory_space<vmem>>, vector<1x8x4xbf16>
    %191 = vector.shape_cast %190 : vector<1x8x4xbf16> to vector<8x4xbf16>
    %192 = arith.truncf %150 : vector<4x256xf32> to vector<4x256xbf16>
    %cst_95 = arith.constant dense<0.000000e+00> : vector<8x256xf32>
    %193 = tpu.matmul %191, %192, %cst_95 {dimension_numbers = #tpu.dot_dimension_numbers<[1], [0], [0], [1], [0, 0, 1, 1], [], []>} : vector<8x4xbf16>, vector<4x256xbf16>, vector<8x256xf32> -> vector<8x256xf32>
    %194 = arith.addf %189, %193 : vector<8x256xf32>
    %c255_i32_96 = arith.constant 255 : i32
    %195 = tpu.dynamic_rotate %150 by %c255_i32_96 dim 1 : vector<4x256xf32>, i32 -> vector<4x256xf32>
    %cst_97 = arith.constant 0.000000e+00 : f32
    %196 = vector.broadcast %cst_97 : f32 to vector<4x256xf32>
    %197 = vector.shape_cast %20 : vector<1x256xi1> to vector<1x256xi1>
    %198 = vector.broadcast %197 : vector<1x256xi1> to vector<4x256xi1>
    %199 = arith.select %198, %195, %196 : vector<4x256xi1>, vector<4x256xf32>
    %c5_98 = arith.constant 5 : index
    %c0_99 = arith.constant 0 : index
    %c0_100 = arith.constant 0 : index
    %200 = vector.load %arg4[%c5_98, %c0_99, %c0_100] : memref<9x8x4xbf16, #tpu.memory_space<vmem>>, vector<1x8x4xbf16>
    %201 = vector.shape_cast %200 : vector<1x8x4xbf16> to vector<8x4xbf16>
    %202 = arith.truncf %199 : vector<4x256xf32> to vector<4x256xbf16>
    %cst_101 = arith.constant dense<0.000000e+00> : vector<8x256xf32>
    %203 = tpu.matmul %201, %202, %cst_101 {dimension_numbers = #tpu.dot_dimension_numbers<[1], [0], [0], [1], [0, 0, 1, 1], [], []>} : vector<8x4xbf16>, vector<4x256xbf16>, vector<8x256xf32> -> vector<8x256xf32>
    %204 = arith.addf %194, %203 : vector<8x256xf32>
    %c241_i32_102 = arith.constant 241 : i32
    %205 = tpu.dynamic_rotate %150 by %c241_i32_102 dim 1 : vector<4x256xf32>, i32 -> vector<4x256xf32>
    %cst_103 = arith.constant 0.000000e+00 : f32
    %206 = vector.broadcast %cst_103 : f32 to vector<4x256xf32>
    %207 = vector.shape_cast %27 : vector<1x256xi1> to vector<1x256xi1>
    %208 = vector.broadcast %207 : vector<1x256xi1> to vector<4x256xi1>
    %209 = arith.select %208, %205, %206 : vector<4x256xi1>, vector<4x256xf32>
    %c6_104 = arith.constant 6 : index
    %c0_105 = arith.constant 0 : index
    %c0_106 = arith.constant 0 : index
    %210 = vector.load %arg4[%c6_104, %c0_105, %c0_106] : memref<9x8x4xbf16, #tpu.memory_space<vmem>>, vector<1x8x4xbf16>
    %211 = vector.shape_cast %210 : vector<1x8x4xbf16> to vector<8x4xbf16>
    %212 = arith.truncf %209 : vector<4x256xf32> to vector<4x256xbf16>
    %cst_107 = arith.constant dense<0.000000e+00> : vector<8x256xf32>
    %213 = tpu.matmul %211, %212, %cst_107 {dimension_numbers = #tpu.dot_dimension_numbers<[1], [0], [0], [1], [0, 0, 1, 1], [], []>} : vector<8x4xbf16>, vector<4x256xbf16>, vector<8x256xf32> -> vector<8x256xf32>
    %214 = arith.addf %204, %213 : vector<8x256xf32>
    %c240_i32_108 = arith.constant 240 : i32
    %215 = tpu.dynamic_rotate %150 by %c240_i32_108 dim 1 : vector<4x256xf32>, i32 -> vector<4x256xf32>
    %cst_109 = arith.constant 0.000000e+00 : f32
    %216 = vector.broadcast %cst_109 : f32 to vector<4x256xf32>
    %217 = vector.shape_cast %24 : vector<1x256xi1> to vector<1x256xi1>
    %218 = vector.broadcast %217 : vector<1x256xi1> to vector<4x256xi1>
    %219 = arith.select %218, %215, %216 : vector<4x256xi1>, vector<4x256xf32>
    %c7_110 = arith.constant 7 : index
    %c0_111 = arith.constant 0 : index
    %c0_112 = arith.constant 0 : index
    %220 = vector.load %arg4[%c7_110, %c0_111, %c0_112] : memref<9x8x4xbf16, #tpu.memory_space<vmem>>, vector<1x8x4xbf16>
    %221 = vector.shape_cast %220 : vector<1x8x4xbf16> to vector<8x4xbf16>
    %222 = arith.truncf %219 : vector<4x256xf32> to vector<4x256xbf16>
    %cst_113 = arith.constant dense<0.000000e+00> : vector<8x256xf32>
    %223 = tpu.matmul %221, %222, %cst_113 {dimension_numbers = #tpu.dot_dimension_numbers<[1], [0], [0], [1], [0, 0, 1, 1], [], []>} : vector<8x4xbf16>, vector<4x256xbf16>, vector<8x256xf32> -> vector<8x256xf32>
    %224 = arith.addf %214, %223 : vector<8x256xf32>
    %c239_i32_114 = arith.constant 239 : i32
    %225 = tpu.dynamic_rotate %150 by %c239_i32_114 dim 1 : vector<4x256xf32>, i32 -> vector<4x256xf32>
    %cst_115 = arith.constant 0.000000e+00 : f32
    %226 = vector.broadcast %cst_115 : f32 to vector<4x256xf32>
    %227 = vector.shape_cast %28 : vector<1x256xi1> to vector<1x256xi1>
    %228 = vector.broadcast %227 : vector<1x256xi1> to vector<4x256xi1>
    %229 = arith.select %228, %225, %226 : vector<4x256xi1>, vector<4x256xf32>
    %c8_116 = arith.constant 8 : index
    %c0_117 = arith.constant 0 : index
    %c0_118 = arith.constant 0 : index
    %230 = vector.load %arg4[%c8_116, %c0_117, %c0_118] : memref<9x8x4xbf16, #tpu.memory_space<vmem>>, vector<1x8x4xbf16>
    %231 = vector.shape_cast %230 : vector<1x8x4xbf16> to vector<8x4xbf16>
    %232 = arith.truncf %229 : vector<4x256xf32> to vector<4x256xbf16>
    %cst_119 = arith.constant dense<0.000000e+00> : vector<8x256xf32>
    %233 = tpu.matmul %231, %232, %cst_119 {dimension_numbers = #tpu.dot_dimension_numbers<[1], [0], [0], [1], [0, 0, 1, 1], [], []>} : vector<8x4xbf16>, vector<4x256xbf16>, vector<8x256xf32> -> vector<8x256xf32>
    %234 = arith.addf %224, %233 : vector<8x256xf32>
    %235 = vector.broadcast %31 : vector<8x1xf32> to vector<8x256xf32>
    %236 = arith.addf %234, %235 : vector<8x256xf32>
    %cst_120 = arith.constant 0.000000e+00 : f32
    %237 = vector.broadcast %cst_120 : f32 to vector<8x256xf32>
    %238 = arith.cmpf ogt, %236, %237 : vector<8x256xf32>
    %cst_121 = arith.constant 0.00999999977 : f32
    %239 = vector.broadcast %cst_121 : f32 to vector<8x256xf32>
    %240 = arith.mulf %239, %236 : vector<8x256xf32>
    %241 = arith.select %238, %236, %240 : vector<8x256xi1>, vector<8x256xf32>
    %c1_122 = arith.constant 1 : index
    %c0_123 = arith.constant 0 : index
    %c0_124 = arith.constant 0 : index
    %242 = vector.load %arg1[%c1_122, %c0_123, %c0_124] : memref<2x8x256xf32, #tpu.memory_space<vmem>>, vector<1x8x256xf32>
    %243 = vector.shape_cast %242 : vector<1x8x256xf32> to vector<8x256xf32>
    %244 = arith.addf %241, %243 : vector<8x256xf32>
    %c1_125 = arith.constant 1 : index
    %c0_126 = arith.constant 0 : index
    %c0_127 = arith.constant 0 : index
    %245 = vector.load %arg6[%c1_125, %c0_126, %c0_127] : memref<2x8x256xf32, #tpu.memory_space<vmem>>, vector<1x8x256xf32>
    %246 = vector.shape_cast %245 : vector<1x8x256xf32> to vector<8x256xf32>
    %247 = vector.shape_cast %244 : vector<8x256xf32> to vector<1x8x256xf32>
    tpu.vector_store %arg6[%c1_125, %c0_126, %c0_127], %247 {strides = array<i32>} : memref<2x8x256xf32, #tpu.memory_space<vmem>>, vector<1x8x256xf32>,
    return
  }
  func.func @transform_0(%arg0: i32) -> (i32, i32, i32) {
    %c0_i32 = arith.constant 0 : i32
    %c0_i32_0 = arith.constant 0 : i32
    %c0_i32_1 = arith.constant 0 : i32
    return %arg0, %c0_i32, %c0_i32_0 : i32, i32, i32
  }
  func.func @transform_1(%arg0: i32) -> (i32, i32) {
    %c0_i32 = arith.constant 0 : i32
    %c0_i32_0 = arith.constant 0 : i32
    %c0_i32_1 = arith.constant 0 : i32
    return %c0_i32, %c0_i32_0 : i32, i32
  }
  func.func @transform_2(%arg0: i32) -> (i32, i32) {
    %c0_i32 = arith.constant 0 : i32
    %c0_i32_0 = arith.constant 0 : i32
    %c0_i32_1 = arith.constant 0 : i32
    return %c0_i32, %c0_i32_0 : i32, i32
  }
  func.func @transform_3(%arg0: i32) -> (i32, i32, i32) {
    %c0_i32 = arith.constant 0 : i32
    %c0_i32_0 = arith.constant 0 : i32
    %c0_i32_1 = arith.constant 0 : i32
    %c0_i32_2 = arith.constant 0 : i32
    return %c0_i32, %c0_i32_0, %c0_i32_1 : i32, i32, i32
  }
  func.func @transform_4(%arg0: i32) -> (i32, i32) {
    %c0_i32 = arith.constant 0 : i32
    %c0_i32_0 = arith.constant 0 : i32
    %c0_i32_1 = arith.constant 0 : i32
    return %c0_i32, %c0_i32_0 : i32, i32
  }
  func.func @transform_5(%arg0: i32) -> (i32, i32, i32) {
    %c0_i32 = arith.constant 0 : i32
    %c0_i32_0 = arith.constant 0 : i32
    %c0_i32_1 = arith.constant 0 : i32
    return %arg0, %c0_i32, %c0_i32_0 : i32, i32, i32
  }
}

</mosaic_0001>

<bundles_post_ra>
// kernel: dark_residual_block.1
= control target key start
LH: loop header
LB: loop body
LE: loop exit
PB: predicated region body
PF: predicated region fallthrough
CT: control target
= control target key end

     0   :  { %s1874_s18 = smov 0   ;;  %s2322_s0 = inlined_call_operand.vmem [shape: f32[4,8,256], index: 0, kind: input, shape index: {}]   ;;  %s2323_s1 = inlined_call_operand.vmem [shape: bf16[4,8], index: 1, kind: input, shape index: {}]   ;;  %s2324_s2 = inlined_call_operand.vmem [shape: f32[4,1], index: 2, kind: input, shape index: {}]   ;;  %s2325_s3 = inlined_call_operand.vmem [shape: bf16[9,8,4], index: 3, kind: input, shape index: {}]   ;;  %s2326_s4 = inlined_call_operand.vmem [shape: f32[8,1], index: 4, kind: input, shape index: {}]   ;;  %s2327_s5 = inlined_call_operand.vmem [shape: f32[4,8,256], index: 5, kind: output, shape index: {}]  }
   0x1 LB: > { %s1653_s19 = sadd.s32 4294967295, %s1833_s18   ;;  %p1657_p0 = scmp.ge.s32.totalorder %s1833_s18, 1  ;;  %s1833_s18 = sphi %s1874_s18, %s15_s18  }
   0x2   : > { %p189_p1 = scmp.lt.s32.totalorder %s1833_s18, 3 }
   0x4   : > { %p190_p2 = pnand %p1657_p0, %p189_p1 }
   0x5   : > { %s1658_s20 = sshll.u32 (!%p190_p2), %s1653_s19, 1  ;;  %v1835_v0 = vmov (!%p190_p2), 0   ;;  %v278_v1 = vld [vmem:[%s2324_s2] sm:$0xf] (!%p190_p2)  ;;  %vm293_vm0 = vcmask (!%p190_p2), 1043456   ;;  %vm289_vm1 = vcmask (!%p190_p2), 64512   ;;  %v234_v20 = vlaneseq (!%p190_p2) }
   0x6   : > { %193 = sbr.rel (%p190_p2) target bundleno = 1002 (0x3ea), region = 40  ;;  %p220_p3 = scmp.lt.s32.totalorder (!%p190_p2), %s1658_s20, 3  ;;  %332 = vmatprep.mubr.bf16.mxu0 (!%p190_p2), %v1835_v0  ;;  %1745 = vset.pattern.permute.xlu0 (!%p190_p2), %v1835_v0  ;;  %v1914_v7 = vld [vmem:[%s2323_s1] sm:$0x3] (!%p190_p2)  ;;  %vm384_vm13 = vcmask (!%p190_p2), 1041408   ;;  %vm380_vm15 = vcmask (!%p190_p2), 31744  }
   0x7   : > { %286 = vperm.xlu0 (!%p190_p2), %1745, %v278_v1   ;;  %423 = vmatprep.mubr.bf16.mxu1 (!%p190_p2), %v1835_v0  ;;  %s1836_s29 = smov (!%p190_p2), 1   ;;  %s1837_s30 = smov (!%p190_p2), 17   ;;  %v1937_v21 = vand.u32 (!%p190_p2), 127, %v234_v20  ;;  %v360_v60 = vld [vmem:[%s2325_s3] sm:$0xf] (!%p190_p2) }
   0x8   : > { %1826 = vset.pattern.permute.xlu1 (!%p190_p2), %v1835_v0  ;;  %s1838_s6 = smov (!%p190_p2), 127   ;;  %s1839_s7 = smov (!%p190_p2), 112   ;;  %v1696_v26 = vld [vmem:[%s2325_s3 + $0x4] sm:$0xf] (!%p190_p2) }
   0x9   : > { %s1840_s8 = smov (!%p190_p2), 16   ;;  %s1841_s9 = smov (!%p190_p2), 15   ;;  %v1940_v22 = vadd.s32 (!%p190_p2), 128, %v1937_v21  ;;  %v241_v23 = vand.u32 (!%p190_p2), 15, %v1937_v21  ;;  %vm2331_vm5 = vcmp.ge.s32.totalorder (!%p190_p2), %v1937_v21, 16  ;;  %vm2330_vm7 = vcmp.lt.s32.totalorder (!%p190_p2), %v1937_v21, 1 }
   0xa   : > { %s1842_s10 = smov (!%p190_p2), 113   ;;  %s1843_s11 = smov (!%p190_p2), 111   ;;  %vm351_vm8 = vcmp.lt.s32.totalorder (!%p190_p2), %v1937_v21, 17  ;;  %vm2328_vm11 = vcmp.lt.s32.totalorder (!%p190_p2), %v1937_v21, 127  ;;  %vm2332_vm12 = vcmp.lt.s32.totalorder (!%p190_p2), %v1937_v21, 112  ;;  %vm2329_vm14 = vcmp.lt.s32.totalorder (!%p190_p2), %v1937_v21, 15 }
   0xb   : > { %v248_v24 = vand.u32 (!%p190_p2), 15, %v1940_v22  ;;  %vm1944_vm4 = vcmp.ge.s32.totalorder (!%p190_p2), %v241_v23, 1 }
   0xc   : > { %vm1959_vm9 = vmand (!%p190_p2), %vm2331_vm5, %vm1944_vm4 }
   0xd   : > { %s2362_s20 = smov (!%p220_p3, %s1658_s20), 3  ;;  %vm1949_vm6 = vcmp.ge.s32.totalorder %v248_v24, 1  ;;  %vm1973_vm10 = vcmp.le.s32.totalorder %v248_v24, 14 }
   0xe   : > { %s1726_s23 = sshll.u32 %s2362_s20, 4 }
   0xf   : > { %s1897_s26 = scalar_lea.vmem %s2322_s0, %s1726_s23  ;;  %s2299_s14 = scalar_lea.vmem %s2327_s5, %s1726_s23 }
  0x10   : > { %v1900_v2 = vld [vmem:[%s1897_s26 + $0x8] sm:$0xff]  ;;  %v1903_v3 = vld [vmem:[%s1897_s26] sm:$0xff] }
  0x11   : > { %v283_v4 = vpack.c.bf16 %v1900_v2, %v1900_v2  ;;  %v282_v5 = vpack.c.bf16 %v1903_v3, %v1903_v3 }
  0x13   : > { %1664 = vmatprep.subr.msk.bf16.mxu0 %vm293_vm0, %v283_v4  ;;  %v295_v6 = vsel %vm293_vm0, %v282_v5, 0 }
  0x14   : > { %301 = vmatpush1.bf16.msra.mxu0 %v295_v6 }
  0x17   : > { %1665 = vmatmul.mubr.msk.bf16.vlgmr.msra.gmra.mrb[0].mxu0 %vm289_vm1, %v1914_v7 }
  0x18   : > { %473 = vmatprep.mubr.bf16.mxu0 %v1835_v0 }
  0x86   : > { %v1919_v8 = vpop.permute.xlu0 %286 }
  0xea   : > { %v334_v9 = vpop.f32.mrb[0].mxu0 }
  0xeb   : > { %v335_v10 = vadd.f32 %v334_v9, %v1919_v8  ;;  %v336_v11 = vpop.f32.mrb[1].mxu0 }
  0xec   : > { %v337_v12 = vadd.f32 %v336_v11, %v1919_v8  ;;  %v338_v13 = vpop.f32.mrb[2].mxu0 }
  0xed   : > { %vm341_vm2 = vcmp.gt.f32.partialorder %v335_v10, 0.0  ;;  %v343_v14 = vmul.f32 0.01, %v335_v10  ;;  %v339_v15 = vpop.f32.mrb[3].mxu0 }
  0xee   : > { %vm342_vm3 = vcmp.gt.f32.partialorder %v337_v12, 0.0  ;;  %v344_v16 = vmul.f32 0.01, %v337_v12 }
  0xef   : > { %v1923_v17 = vsel %vm341_vm2, %v335_v10, %v343_v14  ;;  %vm367_vm2 = vcmp.lt.s32.totalorder %v1937_v21, 16 }
  0xf0   : > { %v1925_v18 = vsel %vm342_vm3, %v337_v12, %v344_v16  ;;  %vm2003_vm3 = vcmp.le.s32.totalorder %v241_v23, 14 }
  0xf1   : > { %v1751_v19 = vpack.i.bf16 %v1925_v18, %v1923_v17 }
  0xf3   : > { %1752 = vrot.lane.b32.xlu1 %v1751_v19, %s1836_s29  ;;  %1747 = vrot.lane.b32.xlu0 %v1751_v19, %s1837_s30 }
  0xf7   : > { %1757 = vrot.lane.b32.xlu1 %v1751_v19, %s1838_s6  ;;  %1762 = vrot.lane.b32.xlu0 %v1751_v19, %s1839_s7 }
  0xfb   : > { %1767 = vrot.lane.b32.xlu1 %v1751_v19, %s1840_s8  ;;  %1772 = vrot.lane.b32.xlu0 %v1751_v19, %s1841_s9 }
  0xff   : > { %1777 = vrot.lane.b32.xlu1 %v1751_v19, %s1842_s10  ;;  %1782 = vrot.lane.b32.xlu0 %v1751_v19, %s1843_s11 }
 0x165   : > { %v1753_v27 = vpop.permute.xlu1 %1752  ;;  %v1748_v28 = vpop.permute.xlu0 %1747 }
 0x166   : > { %v1755_v29 = vunpack.i.h.bf16 %v1753_v27  ;;  %v1754_v30 = vunpack.i.l.bf16 %v1753_v27  ;;  %v1750_v31 = vunpack.i.h.bf16 %v1748_v28  ;;  %v1749_v32 = vunpack.i.l.bf16 %v1748_v28 }
 0x168   : > { %v556_v34 = vsel %vm2330_vm7, %v1754_v30, %v1755_v29  ;;  %v557_v35 = vsel %vm2330_vm7, %v1755_v29, %v1754_v30  ;;  %v352_v36 = vsel %vm351_vm8, %v1749_v32, %v1750_v31  ;;  %v353_v37 = vsel %vm351_vm8, %v1750_v31, %v1749_v32  ;;  %v1666_v32 = vld [vmem:[%s2325_s3 + $0x4] sm:$0xf] }
 0x169   : > { %v359_v38 = vsel %vm1949_vm6, %v352_v36, 0.0  ;;  %v1758_v40 = vpop.permute.xlu1 %1757  ;;  %v1978_v41 = vpop.permute.xlu0 %1762  ;;  %v358_v42 = vsel %vm1959_vm9, %v353_v37, 0.0  ;;  %v563_v43 = vsel %vm1949_vm6, %v556_v34, 0.0  ;;  %v562_v46 = vsel %vm1944_vm4, %v557_v35, 0.0  ;;  %v1674_v34 = vld [vmem:[%s2325_s3 + $0xc] sm:$0xf] }
 0x16a   : > { %v1760_v44 = vunpack.i.h.bf16 %v1758_v40  ;;  %v1759_v45 = vunpack.i.l.bf16 %v1758_v40  ;;  %v362_v47 = vpack.c.bf16 %v359_v38, %v359_v38  ;;  %v361_v48 = vpack.c.bf16 %v358_v42, %v358_v42 }
 0x16b   : > { %v567_v54 = vpack.c.bf16 %v563_v43, %v563_v43  ;;  %v566_v55 = vpack.c.bf16 %v562_v46, %v562_v46  ;;  %v1765_v62 = vunpack.i.h.bf16 %v1978_v41  ;;  %v1764_v63 = vunpack.i.l.bf16 %v1978_v41 }
 0x16c   : > { %v682_v49 = vsel %vm2328_vm11, %v1760_v44, %v1759_v45  ;;  %1669 = vmatprep.subr.msk.bf16.mxu0 %vm384_vm13, %v362_v47  ;;  %v436_v53 = vsel %vm384_vm13, %v361_v48, 0  ;;  %v681_v61 = vsel %vm2328_vm11, %v1759_v45, %v1760_v44  ;;  %vm2019_vm11 = vmand %vm2331_vm5, %vm2003_vm3  ;;  %vm2333_vm7 = vcmp.lt.s32.totalorder %v1937_v21, 113  ;;  %v2075_v47 = vld [vmem:[%s1897_s26 + $0x18] sm:$0xff] }
 0x16d   : > { %v688_v50 = vsel %vm1973_vm10, %v682_v49, 0.0  ;;  %v1768_v51 = vpop.permute.xlu1 %1767  ;;  %v1773_v52 = vpop.permute.xlu0 %1772  ;;  %442 = vmatpush1.bf16.msra.mxu0 %v436_v53  ;;  %v572_v11 = vsel %vm384_vm13, %v566_v55, 0  ;;  %v687_v16 = vsel %vm2003_vm3, %v681_v61, 0.0  ;;  %v820_v19 = vsel %vm2332_vm12, %v1765_v62, %v1764_v63  ;;  %v1671_v49 = vld [vmem:[%s2325_s3 + $0x8] sm:$0xf] }
 0x16e   : > { %v1770_v56 = vunpack.i.h.bf16 %v1768_v51  ;;  %v1769_v57 = vunpack.i.l.bf16 %v1768_v51  ;;  %v1775_v58 = vunpack.i.h.bf16 %v1773_v52  ;;  %v1774_v59 = vunpack.i.l.bf16 %v1773_v52  ;;  %1675 = vmatprep.subr.msk.bf16.mxu0 %vm384_vm13, %v567_v54  ;;  %v2091_v54 = vld [vmem:[%s1897_s26 + $0x10] sm:$0xff] }
 0x16f   : > { %v692_v12 = vpack.c.bf16 %v688_v50, %v688_v50  ;;  %v691_v29 = vpack.c.bf16 %v687_v16, %v687_v16  ;;  %v623_v41 = vpack.c.bf16 %v1925_v18, %v1925_v18  ;;  %v819_v42 = vsel %vm2332_vm12, %v1764_v63, %v1765_v62  ;;  %v1680_v50 = vld [vmem:[%s2325_s3 + $0x14] sm:$0xf] }
 0x170   : > { %v487_v4 = vsel %vm2329_vm14, %v1774_v59, %v1775_v58  ;;  %v488_v5 = vsel %vm2329_vm14, %v1775_v58, %v1774_v59  ;;  %v368_v6 = vsel %vm367_vm2, %v1769_v57, %v1770_v56  ;;  %v369_v9 = vsel %vm367_vm2, %v1770_v56, %v1769_v57  ;;  %1670 = vmatmul.mubr.msk.bf16.vlgmr.msra.gmra.mrb[4].mxu0 %vm380_vm15, %v360_v60 }
 0x171   : > { %v379_v13 = vpack.c.bf16 %v368_v6, %v368_v6  ;;  %v374_v14 = vsel %vm2331_vm5, %v369_v9, 0.0  ;;  %v494_v15 = vsel %vm1973_vm10, %v487_v4, 0.0  ;;  %578 = vmatpush1.bf16.msra.mxu0 %v572_v11  ;;  %609 = vmatprep.mubr.bf16.mxu0 %v1835_v0  ;;  %vm268_vm14 = vcmp.lt.s32.totalorder %v1940_v22, 240  ;;  %v1778_v24 = vpop.permute.xlu1 %1777  ;;  %v1783_v18 = vpop.permute.xlu0 %1782  ;;  %v1677_v4 = vld [vmem:[%s2325_s3 + $0x10] sm:$0xf] }
 0x172   : > { %1681 = vmatprep.subr.msk.bf16.mxu0 %vm384_vm13, %v692_v12  ;;  %v378_v20 = vpack.c.bf16 %v374_v14, %v374_v14  ;;  %v493_v23 = vsel %vm2019_vm11, %v488_v5, 0.0  ;;  %v498_v28 = vpack.c.bf16 %v494_v15, %v494_v15  ;;  %v826_v31 = vsel %vm268_vm14, %v820_v19, 0.0  ;;  %vm2062_vm5 = vmand %vm268_vm14, %vm1949_vm6  ;;  %v1686_v5 = vld [vmem:[%s2325_s3 + $0x1c] sm:$0xf]  ;;  %v1683_v15 = vld [vmem:[%s2325_s3 + $0x18] sm:$0xf] }
 0x173   : > { %1667 = vmatprep.subr.msk.bf16.mxu1 %vm384_vm13, %v379_v13  ;;  %v497_v30 = vpack.c.bf16 %v493_v23, %v493_v23  ;;  %v1780_v35 = vunpack.i.h.bf16 %v1778_v24  ;;  %v1779_v36 = vunpack.i.l.bf16 %v1778_v24  ;;  %v697_v37 = vsel %vm384_vm13, %v691_v29, 0  ;;  %v1689_v19 = vld [vmem:[%s2325_s3 + $0x20] sm:$0xf]  ;;  %v1704_v22 = vld [vmem:[%s2325_s3 + $0xc] sm:$0xf] }
 0x174   : > { %v386_v27 = vsel %vm384_vm13, %v378_v20, 0  ;;  %v830_v40 = vpack.c.bf16 %v826_v31, %v826_v31  ;;  %v622_v45 = vpack.c.bf16 %v1923_v17, %v1923_v17  ;;  %v829_v46 = vpack.c.bf16 %v819_v42, %v819_v42 }
 0x175   : > { %392 = vmatpush1.bf16.msra.mxu1 %v386_v27  ;;  %v503_v38 = vsel %vm384_vm13, %v497_v30, 0  ;;  %v751_v44 = vsel %vm2333_vm7, %v1780_v35, %v1779_v36  ;;  %v750_v51 = vsel %vm2333_vm7, %v1779_v36, %v1780_v35  ;;  %v1785_v52 = vunpack.i.h.bf16 %v1783_v18  ;;  %vm2103_vm7 = vmand %vm268_vm14, %vm1973_vm10 }
 0x176   : > { %1672 = vmatprep.subr.msk.bf16.mxu1 %vm384_vm13, %v498_v28  ;;  %v757_v48 = vsel %vm2062_vm5, %v751_v44, 0.0  ;;  %v1784_v53 = vunpack.i.l.bf16 %v1783_v18  ;;  %vm887_vm12 = vcmp.lt.s32.totalorder %v1937_v21, 111  ;;  %v973_v17 = vpack.c.bf16 %v2075_v47, %v2075_v47 }
 0x177   : > { %v628_v55 = vsel %vm384_vm13, %v622_v45, 0  ;;  %v835_v56 = vsel %vm384_vm13, %v829_v46, 0  ;;  %v761_v57 = vpack.c.bf16 %v757_v48, %v757_v48  ;;  %v756_v58 = vsel %vm1944_vm4, %v750_v51, 0.0 }
 0x178   : > { %1668 = vmatmul.mubr.msk.bf16.vlgmr.msra.gmra.mrb[0].mxu1 %vm380_vm15, %v1666_v32  ;;  %1676 = vmatmul.mubr.msk.bf16.vlgmr.msra.gmra.mrb[8].mxu0 %vm380_vm15, %v1674_v34  ;;  %v889_v60 = vsel %vm887_vm12, %v1785_v52, %v1784_v53  ;;  %v972_v61 = vpack.c.bf16 %v2091_v54, %v2091_v54  ;;  %v760_v62 = vpack.c.bf16 %v756_v58, %v756_v58 }
 0x179   : > { %703 = vmatpush1.bf16.msra.mxu0 %v697_v37  ;;  %509 = vmatpush1.bf16.msra.mxu1 %v503_v38  ;;  %v895_v63 = vsel %vm2103_vm7, %v889_v60, 0.0  ;;  %v888_v6 = vsel %vm887_vm12, %v1784_v53, %v1785_v52 }
 0x17a   : > { %1687 = vmatprep.subr.msk.bf16.mxu0 %vm384_vm13, %v830_v40  ;;  %1678 = vmatprep.subr.msk.bf16.mxu1 %vm384_vm13, %v623_v41  ;;  %v975_v9 = vsel %vm293_vm0, %v972_v61, 0  ;;  %v766_v11 = vsel %vm384_vm13, %v760_v62, 0  ;;  %v899_v12 = vpack.c.bf16 %v895_v63, %v895_v63  ;;  %v894_v13 = vsel %vm2003_vm3, %v888_v6, 0.0 }
 0x17b   : > { %540 = vmatprep.mubr.bf16.mxu1 %v1835_v0  ;;  %734 = vmatprep.mubr.bf16.mxu0 %v1835_v0  ;;  %v898_v14 = vpack.c.bf16 %v894_v13, %v894_v13 }
 0x17d   : > { %v904_v16 = vsel %vm384_vm13, %v898_v14, 0 }
 0x180   : > { %1673 = vmatmul.mubr.msk.bf16.vlgmr.msra.gmra.mrb[4].mxu1 %vm380_vm15, %v1671_v49  ;;  %1682 = vmatmul.mubr.msk.bf16.vlgmr.msra.gmra.mrb[12].mxu0 %vm380_vm15, %v1680_v50 }
 0x181   : > { %634 = vmatpush1.bf16.msra.mxu1 %v628_v55  ;;  %841 = vmatpush1.bf16.msra.mxu0 %v835_v56 }
 0x182   : > { %1684 = vmatprep.subr.msk.bf16.mxu1 %vm384_vm13, %v761_v57  ;;  %665 = vmatprep.mubr.bf16.mxu1 %v1835_v0 }
 0x183   : > { %872 = vmatprep.mubr.bf16.mxu0 %v1835_v0  ;;  %1694 = vmatprep.subr.msk.bf16.mxu0 %vm293_vm0, %v973_v17 }
 0x188   : > { %1679 = vmatmul.mubr.msk.bf16.vlgmr.msra.gmra.mrb[8].mxu1 %vm380_vm15, %v1677_v4  ;;  %1688 = vmatmul.mubr.msk.bf16.vlgmr.msra.gmra.mrb[16].mxu0 %vm380_vm15, %v1686_v5 }
 0x189   : > { %772 = vmatpush1.bf16.msra.mxu1 %v766_v11  ;;  %981 = vmatpush1.bf16.msra.mxu0 %v975_v9 }
 0x18a   : > { %1690 = vmatprep.subr.msk.bf16.mxu1 %vm384_vm13, %v899_v12  ;;  %803 = vmatprep.mubr.bf16.mxu1 %v1835_v0 }
 0x18b   : > { %1012 = vmatprep.mubr.bf16.mxu0 %v1835_v0 }
 0x190   : > { %1685 = vmatmul.mubr.msk.bf16.vlgmr.msra.gmra.mrb[12].mxu1 %vm380_vm15, %v1683_v15  ;;  %1695 = vmatmul.mubr.msk.bf16.vlgmr.msra.gmra.mrb[20].mxu0 %vm289_vm1, %v1914_v7 }
 0x191   : > { %910 = vmatpush1.bf16.msra.mxu1 %v904_v16  ;;  %941 = vmatprep.mubr.bf16.mxu1 %v1835_v0 }
 0x192   : > { %1140 = vmatprep.mubr.bf16.mxu0 %v1835_v0 }
 0x198   : > { %1691 = vmatmul.mubr.msk.bf16.vlgmr.msra.gmra.mrb[16].mxu1 %vm380_vm15, %v1689_v19 }
 0x199   : > { %1090 = vmatprep.mubr.bf16.mxu1 %v1835_v0 }
 0x243   : > { %v475_v20 = vpop.f32.mrb[4].mxu0 }
 0x244   : > { %v477_v23 = vpop.f32.mrb[5].mxu0 }
 0x245   : > { %v479_v24 = vpop.f32.mrb[6].mxu0 }
 0x246   : > { %v480_v27 = vpop.f32.mrb[7].mxu0 }
 0x24b   : > { %v425_v28 = vpop.f32.mrb[0].mxu1  ;;  %v611_v29 = vpop.f32.mrb[8].mxu0 }
 0x24c   : > { %v476_v7 = vadd.f32 %v475_v20, %v425_v28  ;;  %v427_v30 = vpop.f32.mrb[1].mxu1  ;;  %v613_v31 = vpop.f32.mrb[9].mxu0 }
 0x24d   : > { %v478_v32 = vadd.f32 %v477_v23, %v427_v30  ;;  %v615_v34 = vpop.f32.mrb[10].mxu0  ;;  %v429_v35 = vpop.f32.mrb[2].mxu1 }
 0x24e   : > { %v616_v36 = vpop.f32.mrb[11].mxu0  ;;  %v430_v37 = vpop.f32.mrb[3].mxu1 }
 0x253   : > { %v542_v38 = vpop.f32.mrb[4].mxu1  ;;  %v736_v40 = vpop.f32.mrb[12].mxu0 }
 0x254   : > { %v549_v41 = vadd.f32 %v542_v38, %v476_v7  ;;  %v544_v42 = vpop.f32.mrb[5].mxu1  ;;  %v738_v44 = vpop.f32.mrb[13].mxu0  ;;  %v279_v38 = vld [vmem:[%s2326_s4] sm:$0xff] }
 0x255   : > { %v550_v18 = vadd.f32 %v544_v42, %v478_v32  ;;  %v740_v45 = vpop.f32.mrb[14].mxu0  ;;  %v546_v46 = vpop.f32.mrb[6].mxu1 }
 0x256   : > { %v741_v48 = vpop.f32.mrb[15].mxu0  ;;  %v547_v49 = vpop.f32.mrb[7].mxu1  ;;  %v618_v50 = vadd.f32 %v611_v29, %v549_v41 }
 0x257   : > { %v619_v51 = vadd.f32 %v613_v31, %v550_v18 }
 0x25b   : > { %v667_v52 = vpop.f32.mrb[8].mxu1  ;;  %v874_v53 = vpop.f32.mrb[16].mxu0 }
 0x25c   : > { %v674_v17 = vadd.f32 %v667_v52, %v618_v50  ;;  %v669_v55 = vpop.f32.mrb[9].mxu1  ;;  %v876_v56 = vpop.f32.mrb[17].mxu0 }
 0x25d   : > { %v675_v57 = vadd.f32 %v669_v55, %v619_v51  ;;  %v878_v58 = vpop.f32.mrb[18].mxu0  ;;  %v671_v60 = vpop.f32.mrb[10].mxu1 }
 0x25e   : > { %v879_v61 = vpop.f32.mrb[19].mxu0  ;;  %v672_v62 = vpop.f32.mrb[11].mxu1  ;;  %v743_v63 = vadd.f32 %v736_v40, %v674_v17 }
 0x25f   : > { %v744_v4 = vadd.f32 %v738_v44, %v675_v57 }
 0x263   : > { %v805_v5 = vpop.f32.mrb[12].mxu1  ;;  %v1014_v6 = vpop.f32.mrb[20].mxu0 }
 0x264   : > { %v812_v9 = vadd.f32 %v805_v5, %v743_v63  ;;  %v1015_v11 = vadd.f32 %v1014_v6, %v1919_v8  ;;  %v807_v12 = vpop.f32.mrb[13].mxu1  ;;  %v1016_v13 = vpop.f32.mrb[21].mxu0 }
 0x265   : > { %v813_v14 = vadd.f32 %v807_v12, %v744_v4  ;;  %v1017_v15 = vadd.f32 %v1016_v13, %v1919_v8  ;;  %v1018_v16 = vpop.f32.mrb[22].mxu0  ;;  %v809_v19 = vpop.f32.mrb[14].mxu1 }
 0x266   : > { %vm1021_vm0 = vcmp.gt.f32.partialorder %v1015_v11, 0.0  ;;  %v1023_v20 = vmul.f32 0.01, %v1015_v11  ;;  %v1019_v23 = vpop.f32.mrb[23].mxu0  ;;  %v810_v24 = vpop.f32.mrb[15].mxu1  ;;  %v881_v27 = vadd.f32 %v874_v53, %v812_v9 }
 0x267   : > { %vm1022_vm1 = vcmp.gt.f32.partialorder %v1017_v15, 0.0  ;;  %v1024_v28 = vmul.f32 0.01, %v1017_v15  ;;  %v882_v29 = vadd.f32 %v876_v56, %v813_v14 }
 0x268   : > { %v2150_v7 = vsel %vm1021_vm0, %v1015_v11, %v1023_v20  ;;  %vm2350_vm0 = vcmp.ge.s32.totalorder %v1937_v21, 16 }
 0x269   : > { %v2152_v30 = vsel %vm1022_vm1, %v1017_v15, %v1024_v28 }
 0x26a   : > { %v1791_v31 = vpack.i.bf16 %v2152_v30, %v2150_v7  ;;  %v1277_v39 = vpack.c.bf16 %v2152_v30, %v2152_v30 }
 0x26b   : > { %v943_v32 = vpop.f32.mrb[16].mxu1 }
 0x26c   : > { %v2156_v34 = vadd.f32 %v943_v32, %v881_v27  ;;  %1792 = vrot.lane.b32.xlu0 %v1791_v31, %s1837_s30  ;;  %1787 = vrot.lane.b32.xlu1 %v1791_v31, %s1840_s8  ;;  %v945_v8 = vpop.f32.mrb[17].mxu1  ;;  %v1035_v27 = vld [vmem:[%s2325_s3] sm:$0xf] }
 0x26d   : > { %v2160_v35 = vadd.f32 %v945_v8, %v882_v29  ;;  %v947_v36 = vpop.f32.mrb[18].mxu1 }
 0x26e   : > { %v948_v37 = vpop.f32.mrb[19].mxu1 }
 0x270   : > { %1802 = vrot.lane.b32.xlu0 %v1791_v31, %s1836_s29  ;;  %1797 = vrot.lane.b32.xlu1 %v1791_v31, %s1841_s9 }
 0x274   : > { %1812 = vrot.lane.b32.xlu0 %v1791_v31, %s1842_s10  ;;  %1807 = vrot.lane.b32.xlu1 %v1791_v31, %s1838_s6 }
 0x278   : > { %1822 = vrot.lane.b32.xlu0 %v1791_v31, %s1843_s11  ;;  %1817 = vrot.lane.b32.xlu1 %v1791_v31, %s1839_s7 }
 0x27c   : > { %954 = vperm.xlu1 %1826, %v279_v38  }
 0x2de   : > { %v1793_v40 = vpop.permute.xlu0 %1792  ;;  %v1788_v41 = vpop.permute.xlu1 %1787 }
 0x2df   : > { %v1795_v42 = vunpack.i.h.bf16 %v1793_v40  ;;  %v1794_v44 = vunpack.i.l.bf16 %v1793_v40  ;;  %v1790_v18 = vunpack.i.h.bf16 %v1788_v41  ;;  %v1789_v45 = vunpack.i.l.bf16 %v1788_v41 }
 0x2e1   : > { %v1031_v46 = vsel %vm351_vm8, %v1794_v44, %v1795_v42  ;;  %v1032_v48 = vsel %vm351_vm8, %v1795_v42, %v1794_v44  ;;  %v1042_v49 = vsel %vm367_vm2, %v1789_v45, %v1790_v18  ;;  %v1043_v50 = vsel %vm367_vm2, %v1790_v18, %v1789_v45 }
 0x2e2   : > { %v1034_v51 = vsel %vm1949_vm6, %v1031_v46, 0.0  ;;  %v1048_v52 = vpack.c.bf16 %v1042_v49, %v1042_v49  ;;  %v1803_v53 = vpop.permute.xlu0 %1802  ;;  %v1798_v17 = vpop.permute.xlu1 %1797  ;;  %v1033_v55 = vsel %vm1959_vm9, %v1032_v48, 0.0  ;;  %v1044_v56 = vsel %vm2350_vm0, %v1043_v50, 0.0 }
 0x2e3   : > { %v1805_v57 = vunpack.i.h.bf16 %v1803_v53  ;;  %v1804_v58 = vunpack.i.l.bf16 %v1803_v53  ;;  %v1800_v60 = vunpack.i.h.bf16 %v1798_v17  ;;  %v1799_v61 = vunpack.i.l.bf16 %v1798_v17  ;;  %v1701_v17 = vld [vmem:[%s2325_s3 + $0x8] sm:$0xf] }
 0x2e4   : > { %1697 = vmatprep.subr.msk.bf16.mxu1 %vm384_vm13, %v1048_v52  ;;  %v1037_v62 = vpack.c.bf16 %v1034_v51, %v1034_v51  ;;  %v1036_v63 = vpack.c.bf16 %v1033_v55, %v1033_v55  ;;  %v1047_v4 = vpack.c.bf16 %v1044_v56, %v1044_v56  ;;  %vm2351_vm8 = vcmp.lt.s32.totalorder %v1937_v21, 1 }
 0x2e5   : > { %v1216_v5 = vsel %vm2351_vm8, %v1804_v58, %v1805_v57  ;;  %vm2352_vm2 = vmmov %vm2351_vm8  ;;  %vm2353_vm9 = vcmp.lt.s32.totalorder %v1937_v21, 15  ;;  %vm2357_vm8 = vcmp.lt.s32.totalorder %v1937_v21, 113  ;;  %v1276_v51 = vpack.c.bf16 %v2150_v7, %v2150_v7 }
 0x2e6   : > { %v1217_v6 = vsel %vm2352_vm2, %v1805_v57, %v1804_v58  ;;  %v1153_v33 = vsel %vm2353_vm9, %v1799_v61, %v1800_v60  ;;  %vm2354_vm1 = vmmov %vm2353_vm9  ;;  %v1219_v11 = vsel %vm1949_vm6, %v1216_v5, 0.0  ;;  %1699 = vmatprep.subr.msk.bf16.mxu0 %vm384_vm13, %v1037_v62  ;;  %v1813_v13 = vpop.permute.xlu0 %1812  ;;  %v1103_v14 = vsel %vm384_vm13, %v1036_v63, 0  ;;  %v1808_v15 = vpop.permute.xlu1 %1807 }
 0x2e7   : > { %v1154_v9 = vsel %vm2354_vm1, %v1800_v60, %v1799_v61  ;;  %v1156_v12 = vsel %vm1973_vm10, %v1153_v33, 0.0  ;;  %v1053_v16 = vsel %vm384_vm13, %v1047_v4, 0  ;;  %v1815_v19 = vunpack.i.h.bf16 %v1813_v13  ;;  %1109 = vmatpush1.bf16.msra.mxu0 %v1103_v14  ;;  %v1707_v33 = vld [vmem:[%s2325_s3 + $0x10] sm:$0xf] }
 0x2e8   : > { %v1814_v20 = vunpack.i.l.bf16 %v1813_v13  ;;  %v1810_v23 = vunpack.i.h.bf16 %v1808_v15  ;;  %v1809_v24 = vunpack.i.l.bf16 %v1808_v15  ;;  %1059 = vmatpush1.bf16.msra.mxu1 %v1053_v16  ;;  %v1159_v28 = vpack.c.bf16 %v1156_v12, %v1156_v12 }
 0x2e9   : > { %v1222_v29 = vpack.c.bf16 %v1219_v11, %v1219_v11  ;;  %v1218_v31 = vsel %vm1944_vm4, %v1217_v6, 0.0  ;;  %v1155_v32 = vsel %vm2019_vm11, %v1154_v9, 0.0  ;;  %vm2355_vm6 = vcmp.lt.s32.totalorder %v1937_v21, 127  ;;  %vm2359_vm11 = vmmov %vm2357_vm8  ;;  %v1710_v9 = vld [vmem:[%s2325_s3 + $0x14] sm:$0xf] }
 0x2ea   : > { %v1334_v8 = vsel %vm2355_vm6, %v1809_v24, %v1810_v23  ;;  %vm2356_vm0 = vmmov %vm2355_vm6  ;;  %1700 = vmatmul.mubr.msk.bf16.vlgmr.msra.gmra.mrb[24].mxu0 %vm380_vm15, %v1035_v27  ;;  %v1221_v38 = vpack.c.bf16 %v1218_v31, %v1218_v31  ;;  %v1818_v40 = vpop.permute.xlu1 %1817  ;;  %v1158_v41 = vpack.c.bf16 %v1155_v32, %v1155_v32  ;;  %v1398_v10 = vsel %vm2357_vm8, %v1815_v19, %v1814_v20  ;;  %v1823_v49 = vpop.permute.xlu0 %1822 }
 0x2eb   : > { %v1335_v36 = vsel %vm2356_vm0, %v1810_v23, %v1809_v24  ;;  %1698 = vmatmul.mubr.msk.bf16.vlgmr.msra.gmra.mrb[20].mxu1 %vm380_vm15, %v1696_v26  ;;  %1702 = vmatprep.subr.msk.bf16.mxu1 %vm384_vm13, %v1159_v28  ;;  %v1820_v42 = vunpack.i.h.bf16 %v1818_v40  ;;  %v1819_v44 = vunpack.i.l.bf16 %v1818_v40  ;;  %v1336_v48 = vsel %vm2003_vm3, %v1334_v8, 0.0  ;;  %v1719_v28 = vld [vmem:[%s2325_s3 + $0x20] sm:$0xf] }
 0x2ec   : > { %v1337_v37 = vsel %vm1973_vm10, %v1335_v36, 0.0  ;;  %1705 = vmatprep.subr.msk.bf16.mxu0 %vm384_vm13, %v1222_v29  ;;  %v1227_v18 = vsel %vm384_vm13, %v1221_v38, 0  ;;  %v1164_v45 = vsel %vm384_vm13, %v1158_v41, 0  ;;  %1201 = vmatprep.mubr.bf16.mxu1 %v1835_v0  ;;  %vm2358_vm10 = vcmp.lt.s32.totalorder %v1937_v21, 112 }
 0x2ed   : > { %v1340_v46 = vpack.c.bf16 %v1337_v37, %v1337_v37  ;;  %1264 = vmatprep.mubr.bf16.mxu0 %v1835_v0  ;;  %1233 = vmatpush1.bf16.msra.mxu0 %v1227_v18  ;;  %v1461_v50 = vsel %vm2358_vm10, %v1820_v42, %v1819_v44  ;;  %v1339_v52 = vpack.c.bf16 %v1336_v48, %v1336_v48  ;;  %v1400_v53 = vsel %vm2062_vm5, %v1398_v10, 0.0  ;;  %vm2360_vm5 = vmmov %vm2358_vm10 }
 0x2ee   : > { %1170 = vmatpush1.bf16.msra.mxu1 %v1164_v45  ;;  %v1463_v30 = vsel %vm268_vm14, %v1461_v50, 0.0  ;;  %v1397_v55 = vsel %vm2359_vm11, %v1814_v20, %v1815_v19  ;;  %v1825_v56 = vunpack.i.h.bf16 %v1823_v49  ;;  %v1824_v57 = vunpack.i.l.bf16 %v1823_v49  ;;  %v1713_v20 = vld [vmem:[%s2325_s3 + $0x18] sm:$0xf] }
 0x2ef   : > { %1708 = vmatprep.subr.msk.bf16.mxu1 %vm384_vm13, %v1277_v39  ;;  %1711 = vmatprep.subr.msk.bf16.mxu0 %vm384_vm13, %v1340_v46  ;;  %v1466_v58 = vpack.c.bf16 %v1463_v30, %v1463_v30  ;;  %v1282_v43 = vsel %vm384_vm13, %v1276_v51, 0  ;;  %v1345_v7 = vsel %vm384_vm13, %v1339_v52, 0  ;;  %v1403_v60 = vpack.c.bf16 %v1400_v53, %v1400_v53 }
 0x2f0   : > { %v1399_v61 = vsel %vm1944_vm4, %v1397_v55, 0.0  ;;  %v1460_v62 = vsel %vm2360_vm5, %v1819_v44, %v1820_v42  ;;  %v1524_v63 = vsel %vm887_vm12, %v1825_v56, %v1824_v57  ;;  %v1523_v25 = vsel %vm887_vm12, %v1824_v57, %v1825_v56 }
 0x2f1   : > { %v1402_v4 = vpack.c.bf16 %v1399_v61, %v1399_v61  ;;  %v1465_v5 = vpack.c.bf16 %v1460_v62, %v1460_v62  ;;  %v1526_v6 = vsel %vm2103_vm7, %v1524_v63, 0.0  ;;  %v1525_v59 = vsel %vm2003_vm3, %v1523_v25, 0.0 }
 0x2f2   : > { %1706 = vmatmul.mubr.msk.bf16.vlgmr.msra.gmra.mrb[28].mxu0 %vm380_vm15, %v1704_v22  ;;  %v1529_v11 = vpack.c.bf16 %v1526_v6, %v1526_v6  ;;  %v1528_v16 = vpack.c.bf16 %v1525_v59, %v1525_v59 }
 0x2f3   : > { %1703 = vmatmul.mubr.msk.bf16.vlgmr.msra.gmra.mrb[24].mxu1 %vm380_vm15, %v1701_v17  ;;  %1351 = vmatpush1.bf16.msra.mxu0 %v1345_v7  ;;  %v1408_v12 = vsel %vm384_vm13, %v1402_v4, 0  ;;  %v1471_v21 = vsel %vm384_vm13, %v1465_v5, 0 }
 0x2f4   : > { %1288 = vmatpush1.bf16.msra.mxu1 %v1282_v43  ;;  %1717 = vmatprep.subr.msk.bf16.mxu0 %vm384_vm13, %v1466_v58  ;;  %v1534_v27 = vsel %vm384_vm13, %v1528_v16, 0 }
 0x2f5   : > { %1714 = vmatprep.subr.msk.bf16.mxu1 %vm384_vm13, %v1403_v60  ;;  %1319 = vmatprep.mubr.bf16.mxu1 %v1835_v0 }
 0x2f6   : > { %1382 = vmatprep.mubr.bf16.mxu0 %v1835_v0 }
 0x2fa   : > { %1712 = vmatmul.mubr.msk.bf16.vlgmr.msra.gmra.mrb[32].mxu0 %vm380_vm15, %v1710_v9 }
 0x2fb   : > { %1709 = vmatmul.mubr.msk.bf16.vlgmr.msra.gmra.mrb[28].mxu1 %vm380_vm15, %v1707_v33  ;;  %1477 = vmatpush1.bf16.msra.mxu0 %v1471_v21  ;;  %v2279_v13 = vpop.permute.xlu1 %954 }
 0x2fc   : > { %1414 = vmatpush1.bf16.msra.mxu1 %v1408_v12  ;;  %v957_v14 = vadd.f32 %v2279_v13, %v2156_v34  ;;  %v958_v15 = vadd.f32 %v2279_v13, %v2160_v35  ;;  %1445 = vmatprep.mubr.bf16.mxu1 %v1835_v0  ;;  %v1716_v34 = vld [vmem:[%s2325_s3 + $0x1c] sm:$0xf] }
 0x2fd   : > { %1720 = vmatprep.subr.msk.bf16.mxu1 %vm384_vm13, %v1529_v11  ;;  %1508 = vmatprep.mubr.bf16.mxu0 %v1835_v0 }
 0x2fe   : > { %vm959_vm4 = vcmp.gt.f32.partialorder %v957_v14, 0.0  ;;  %vm960_vm7 = vcmp.gt.f32.partialorder %v958_v15, 0.0  ;;  %v961_v1 = vmul.f32 0.01, %v957_v14  ;;  %v962_v19 = vmul.f32 0.01, %v958_v15 }
 0x300   : > { %v963_v35 = vsel %vm959_vm4, %v957_v14, %v961_v1  ;;  %v964_v23 = vsel %vm960_vm7, %v958_v15, %v962_v19 }
 0x301   : > { %v965_v24 = vadd.f32 %v963_v35, %v1903_v3  ;;  %v966_v26 = vadd.f32 %v964_v23, %v1900_v2 }
 0x302   : > { %1718 = vmatmul.mubr.msk.bf16.vlgmr.msra.gmra.mrb[36].mxu0 %vm380_vm15, %v1716_v34 }
 0x303   : > { %1715 = vmatmul.mubr.msk.bf16.vlgmr.msra.gmra.mrb[32].mxu1 %vm380_vm15, %v1713_v20  ;;  %967 = vst [vmem:[%s2299_s14] sm:$0xff] %v965_v24  ;;  %968 = vst [vmem:[%s2299_s14 + $0x8] sm:$0xff] %v966_v26 }
 0x304   : > { %1540 = vmatpush1.bf16.msra.mxu1 %v1534_v27  ;;  %1571 = vmatprep.mubr.bf16.mxu1 %v1835_v0 }
 0x30b   : > { %1721 = vmatmul.mubr.msk.bf16.vlgmr.msra.gmra.mrb[36].mxu1 %vm380_vm15, %v1719_v28 }
 0x3bd   : > { %v1142_v29 = vpop.f32.mrb[24].mxu0 }
 0x3be   : > { %v1092_v3 = vpop.f32.mrb[20].mxu1  ;;  %v1144_v32 = vpop.f32.mrb[25].mxu0 }
 0x3bf   : > { %v1094_v2 = vpop.f32.mrb[21].mxu1  ;;  %v1143_v31 = vadd.f32 %v1142_v29, %v1092_v3  ;;  %v1146_v37 = vpop.f32.mrb[26].mxu0 }
 0x3c0   : > { %v1096_v8 = vpop.f32.mrb[22].mxu1  ;;  %v1145_v36 = vadd.f32 %v1144_v32, %v1094_v2  ;;  %v1147_v40 = vpop.f32.mrb[27].mxu0 }
 0x3c1   : > { %v1097_v38 = vpop.f32.mrb[23].mxu1 }
 0x3c5   : > { %v1266_v10 = vpop.f32.mrb[28].mxu0 }
 0x3c6   : > { %v1203_v41 = vpop.f32.mrb[24].mxu1  ;;  %v1268_v44 = vpop.f32.mrb[29].mxu0 }
 0x3c7   : > { %v1210_v42 = vadd.f32 %v1203_v41, %v1143_v31  ;;  %v1205_v0 = vpop.f32.mrb[25].mxu1  ;;  %v1270_v45 = vpop.f32.mrb[30].mxu0 }
 0x3c8   : > { %v1211_v39 = vadd.f32 %v1205_v0, %v1145_v36  ;;  %v1207_v18 = vpop.f32.mrb[26].mxu1  ;;  %v1271_v49 = vpop.f32.mrb[31].mxu0 }
 0x3c9   : > { %v1273_v46 = vadd.f32 %v1266_v10, %v1210_v42  ;;  %v1208_v48 = vpop.f32.mrb[27].mxu1 }
 0x3ca   : > { %v1274_v50 = vadd.f32 %v1268_v44, %v1211_v39 }
 0x3cd   : > { %v1384_v51 = vpop.f32.mrb[32].mxu0 }
 0x3ce   : > { %v1321_v30 = vpop.f32.mrb[28].mxu1  ;;  %v1386_v17 = vpop.f32.mrb[33].mxu0 }
 0x3cf   : > { %v1328_v52 = vadd.f32 %v1321_v30, %v1273_v46  ;;  %v1323_v53 = vpop.f32.mrb[29].mxu1  ;;  %v1388_v56 = vpop.f32.mrb[34].mxu0 }
 0x3d0   : > { %v1329_v22 = vadd.f32 %v1323_v53, %v1274_v50  ;;  %v1325_v55 = vpop.f32.mrb[30].mxu1  ;;  %v1389_v43 = vpop.f32.mrb[35].mxu0 }
 0x3d1   : > { %v1391_v57 = vadd.f32 %v1384_v51, %v1328_v52  ;;  %v1326_v58 = vpop.f32.mrb[31].mxu1 }
 0x3d2   : > { %v1392_v7 = vadd.f32 %v1386_v17, %v1329_v22 }
 0x3d5   : > { %v1510_v61 = vpop.f32.mrb[36].mxu0 }
 0x3d6   : > { %v1447_v60 = vpop.f32.mrb[32].mxu1  ;;  %v1512_v4 = vpop.f32.mrb[37].mxu0 }
 0x3d7   : > { %v1454_v62 = vadd.f32 %v1447_v60, %v1391_v57  ;;  %v1449_v63 = vpop.f32.mrb[33].mxu1  ;;  %v1514_v6 = vpop.f32.mrb[38].mxu0 }
 0x3d8   : > { %v1455_v5 = vadd.f32 %v1449_v63, %v1392_v7  ;;  %v1451_v25 = vpop.f32.mrb[34].mxu1  ;;  %v1515_v11 = vpop.f32.mrb[39].mxu0 }
 0x3d9   : > { %v1517_v33 = vadd.f32 %v1510_v61, %v1454_v62  ;;  %v1452_v9 = vpop.f32.mrb[35].mxu1 }
 0x3da   : > { %v1518_v12 = vadd.f32 %v1512_v4, %v1455_v5 }
 0x3de   : > { %v1573_v21 = vpop.f32.mrb[36].mxu1 }
 0x3df   : > { %v1580_v59 = vadd.f32 %v1573_v21, %v1517_v33  ;;  %v1575_v14 = vpop.f32.mrb[37].mxu1 }
 0x3e0   : > { %v1581_v15 = vadd.f32 %v1575_v14, %v1518_v12  ;;  %v1577_v16 = vpop.f32.mrb[38].mxu1 }
 0x3e1   : > { %v1582_v1 = vadd.f32 %v1580_v59, %v2279_v13  ;;  %v1578_v19 = vpop.f32.mrb[39].mxu1 }
 0x3e2   : > { %v1583_v20 = vadd.f32 %v1581_v15, %v2279_v13 }
 0x3e3   : > { %vm1584_vm12 = vcmp.gt.f32.partialorder %v1582_v1, 0.0  ;;  %v1586_v34 = vmul.f32 0.01, %v1582_v1 }
 0x3e4   : > { %vm1585_vm13 = vcmp.gt.f32.partialorder %v1583_v20, 0.0  ;;  %v1587_v35 = vmul.f32 0.01, %v1583_v20 }
 0x3e5   : > { %v1588_v23 = vsel %vm1584_vm12, %v1582_v1, %v1586_v34 }
 0x3e6   : > { %v1590_v24 = vadd.f32 %v2091_v54, %v1588_v23  ;;  %v1589_v26 = vsel %vm1585_vm13, %v1583_v20, %v1587_v35 }
 0x3e7   : > { %v1591_v27 = vadd.f32 %v2075_v47, %v1589_v26 }
 0x3e8   : > { %1722 = vst [vmem:[%s2299_s14 + $0x10] sm:$0xff] %v1590_v24 }
 0x3e9   : > { %1723 = vst [vmem:[%s2299_s14 + $0x18] sm:$0xff] %v1591_v27 }
 0x3ea PF: > { %s15_s18 = sadd.s32 1, %s1833_s18  }
 0x3eb   : > { %p12_p4 = scmp.ge.s32.totalorder %s15_s18, 4  }
 0x3ed   :  { %14 = sbr.rel (!%p12_p4) target bundleno = 1 (0x1), region = 80 }

</bundles_post_ra>
